<compile_context>
chip_gen: v7x
topology: tpu7x:2x2x1
jax: 0.10.0
libtpu: 0.0.40
codegen_flags: <defaults>
</compile_context>

<pallas_src>
import functools

import jax
import jax.numpy as jnp
from jax import lax
from jax.experimental import pallas as pl
from jax.experimental.pallas import tpu as pltpu

VMEM = pltpu.MemorySpace.VMEM


# ----------------------------------------------------------------------------
# Small helpers
# ----------------------------------------------------------------------------
def _row_tile(n, max_rows):
    """Largest row tile <= max_rows that divides n and is a multiple of 8."""
    if n <= max_rows:
        return n
    for tm in range(max_rows - max_rows % 8, 7, -8):
        if n % tm == 0:
            return tm
    return n  # fall back to a single whole-array block


def _cp(resident_bytes, semantics=None):
    """CompilerParams with a VMEM limit sized from the resident buffers."""
    limit = int(min(max(2 * resident_bytes + (8 << 20), 32 << 20), 100 << 20))
    if semantics is None:
        return pltpu.CompilerParams(vmem_limit_bytes=limit)
    return pltpu.CompilerParams(vmem_limit_bytes=limit,
                                dimension_semantics=semantics)


# ----------------------------------------------------------------------------
# Kernel 1: all CurvatureMLP heads fused.
#   out[:, k] = sigmoid( relu(x @ W1_k + b1_k) @ W2_k + b2_k )
# W1s are concatenated along the output dim, W2 is block-diagonal, so one pair of
# matmuls evaluates every head.  Row-tiled; row axis is megacore-parallel.
# ----------------------------------------------------------------------------
def _fused_mlp_kernel(x_ref, w1_ref, b1_ref, w2_ref, b2_ref, o_ref):
    h = jnp.dot(x_ref[...], w1_ref[...], preferred_element_type=jnp.float32) + b1_ref[...]
    h = jnp.maximum(h, 0.0)
    o = jnp.dot(h, w2_ref[...], preferred_element_type=jnp.float32) + b2_ref[...]
    o_ref[...] = jax.nn.sigmoid(o)           # sigmoid applied exactly once per head


def fused_mlp_apply(x, w1, b1, w2, b2):
    n, f_in = x.shape
    hid = w1.shape[1]
    n_heads = w2.shape[1]
    tm = _row_tile(n, 1024)
    resident = 4 * (tm * f_in + f_in * hid + hid + hid * n_heads + n_heads
                    + tm * n_heads + tm * hid)
    return pl.pallas_call(
        _fused_mlp_kernel,
        out_shape=jax.ShapeDtypeStruct((n, n_heads), jnp.float32),
        grid=(n // tm,),
        in_specs=[
            pl.BlockSpec((tm, f_in), lambda i: (i, 0)),
            pl.BlockSpec((f_in, hid), lambda i: (0, 0)),
            pl.BlockSpec((1, hid), lambda i: (0, 0)),
            pl.BlockSpec((hid, n_heads), lambda i: (0, 0)),
            pl.BlockSpec((1, n_heads), lambda i: (0, 0)),
        ],
        out_specs=pl.BlockSpec((tm, n_heads), lambda i: (i, 0)),
        compiler_params=_cp(resident, ("parallel",)),
    )(x, w1, b1, w2, b2)


# ----------------------------------------------------------------------------
# Kernel 2 (pass A): weighted adjacency + per-row gamma / delta_f for ALL f's.
#   W        = adj * sigmoid(raw_weights)                   (computed once per forward)
#   delta_f  = W @ f       - rowsum(W) * f
#   gamma    = 0.5*(W @ f^2 - 2 f * (W @ f) + rowsum(W) * f^2)
# (algebraically identical to the reference, but never materializes the [N,N]
#  f_diff / W*f_diff temporaries; the two mat-vecs are batched into one wide dot)
# ----------------------------------------------------------------------------
def _curv_stats_kernel(adj_ref, wraw_ref, f_ref, w_ref, gamma_ref, df_ref, *,
                       block_rows):
    row0 = pl.program_id(0) * block_rows
    W = adj_ref[...] * jax.nn.sigmoid(wraw_ref[...])                 # [TM, N]
    w_ref[...] = W
    rowsum = jnp.sum(W, axis=1, keepdims=True)                        # [TM, 1]
    f_all = f_ref[...]                                                # [N, F]
    f_blk = f_ref[pl.ds(row0, block_rows), :]                         # [TM, F]
    num_f = f_all.shape[1]
    rhs = jnp.concatenate([f_all, f_all * f_all], axis=1)             # [N, 2F]
    prod = jnp.dot(W, rhs, preferred_element_type=jnp.float32)        # [TM, 2F]
    wf = prod[:, :num_f]
    wf2 = prod[:, num_f:]
    df_ref[...] = wf - rowsum * f_blk
    gamma_ref[...] = 0.5 * (wf2 - 2.0 * f_blk * wf + rowsum * f_blk * f_blk)


def curv_stats_apply(adj, raw_weights, f_cols):
    n = adj.shape[0]
    num_f = f_cols.shape[1]
    tm = _row_tile(n, 128)
    kernel = functools.partial(_curv_stats_kernel, block_rows=tm)
    resident = 4 * (3 * tm * n + 3 * n * num_f + 2 * tm * num_f)
    return pl.pallas_call(
        kernel,
        out_shape=(jax.ShapeDtypeStruct((n, n), jnp.float32),
                   jax.ShapeDtypeStruct((n, num_f), jnp.float32),
                   jax.ShapeDtypeStruct((n, num_f), jnp.float32)),
        grid=(n // tm,),
        in_specs=[
            pl.BlockSpec((tm, n), lambda i: (i, 0)),
            pl.BlockSpec((tm, n), lambda i: (i, 0)),
            pl.BlockSpec((n, num_f), lambda i: (0, 0)),
        ],
        out_specs=(
            pl.BlockSpec((tm, n), lambda i: (i, 0)),
            pl.BlockSpec((tm, num_f), lambda i: (i, 0)),
            pl.BlockSpec((tm, num_f), lambda i: (i, 0)),
        ),
        compiler_params=_cp(resident, ("parallel",)),
    )(adj, raw_weights, f_cols)


# ----------------------------------------------------------------------------
# Kernel 3 (pass B): gamma2 + hinge loss, all f's at once, per-row partial sums.
#   gamma2 = 0.5 * (W@gamma - rowsum*gamma)
#            - 0.5 * (W@(f*df) - f*(W@df) - df*(W@f) + rowsum*f*df)
#   loss_row[j] = sum_c sum_i relu(kappa[i]*gamma[j,c] - gamma2[j,c])
# Row-tiled, megacore-parallel; the host sums the [N,1] partials.
# ----------------------------------------------------------------------------
def _curv_loss_kernel(w_ref, f_ref, gamma_ref, df_ref, kappa_row_ref, o_ref, *,
                      block_rows):
    row0 = pl.program_id(0) * block_rows
    W = w_ref[...]                                                    # [TM, N]
    rowsum = jnp.sum(W, axis=1, keepdims=True)                        # [TM, 1]
    f_all = f_ref[...]
    g_all = gamma_ref[...]
    df_all = df_ref[...]
    num_f = f_all.shape[1]
    f_blk = f_ref[pl.ds(row0, block_rows), :]
    g_blk = gamma_ref[pl.ds(row0, block_rows), :]
    df_blk = df_ref[pl.ds(row0, block_rows), :]

    rhs = jnp.concatenate([g_all, df_all, f_all * df_all], axis=1)    # [N, 3F]
    prod = jnp.dot(W, rhs, preferred_element_type=jnp.float32)        # [TM, 3F]
    wg = prod[:, :num_f]
    wdf = prod[:, num_f:2 * num_f]
    wfdf = prod[:, 2 * num_f:]

    wf = df_blk + rowsum * f_blk                 # recover W @ f for this block
    delta_gamma = wg - rowsum * g_blk
    gamma_f_delta = 0.5 * (wfdf - f_blk * wdf - df_blk * wf
                           + rowsum * f_blk * df_blk)
    gamma2 = 0.5 * delta_gamma - gamma_f_delta                        # [TM, F]

    kap = kappa_row_ref[...]                                          # [1, N]
    acc = jnp.zeros((block_rows, 1), jnp.float32)
    for c in range(num_f):                       # static unroll (num_f is tiny)
        hinge = jnp.maximum(g_blk[:, c:c + 1] * kap - gamma2[:, c:c + 1], 0.0)
        acc = acc + jnp.sum(hinge, axis=1, keepdims=True)
    o_ref[...] = acc


def curv_loss_apply(weighted_adj, f_cols, gamma, delta_f, kappa_row):
    n = weighted_adj.shape[0]
    num_f = f_cols.shape[1]
    tm = _row_tile(n, 128)
    kernel = functools.partial(_curv_loss_kernel, block_rows=tm)
    resident = 4 * (3 * tm * n + 6 * n * num_f + n + tm)
    return pl.pallas_call(
        kernel,
        out_shape=jax.ShapeDtypeStruct((n, 1), jnp.float32),
        grid=(n // tm,),
        in_specs=[
            pl.BlockSpec((tm, n), lambda i: (i, 0)),
            pl.BlockSpec((n, num_f), lambda i: (0, 0)),
            pl.BlockSpec((n, num_f), lambda i: (0, 0)),
            pl.BlockSpec((n, num_f), lambda i: (0, 0)),
            pl.BlockSpec((1, n), lambda i: (0, 0)),
        ],
        out_specs=pl.BlockSpec((tm, 1), lambda i: (i, 0)),
        compiler_params=_cp(resident, ("parallel",)),
    )(weighted_adj, f_cols, gamma, delta_f, kappa_row)


# ----------------------------------------------------------------------------
# Kernel 4: one DirGNN(GCN) layer (+ relu, + fused log_softmax on the last layer)
#   out = 0.5*GCN_in(A) + 0.5*GCN_out(A^T) + x @ W_root + b_root
# All three feature transforms use ONE concatenated [F_in, 3*F_out] matmul and
# the A^T propagation is a transposed dot_general (A^T never materialized).
# ----------------------------------------------------------------------------
def _dir_gcn_kernel(x_ref, a_ref, dis_ref, dos_ref, w_ref, b_ref, o_ref, *,
                    f_out, last):
    x = x_ref[...]
    A = a_ref[...]                                  # [N,N]; A[i,j]=1 edge i->j
    dis = dis_ref[...]                              # [N,1] 1/sqrt(in-degree)
    dos = dos_ref[...]                              # [N,1] 1/sqrt(out-degree)
    b = b_ref[...]                                  # [1, 3*f_out]

    xw = jnp.dot(x, w_ref[...], preferred_element_type=jnp.float32)   # [N, 3*f_out]
    xw_in = xw[:, :f_out]
    xw_out = xw[:, f_out:2 * f_out]
    xw_root = xw[:, 2 * f_out:]

    # incoming-edge aggregation == A^T @ (dis * xw_in), contracting A's axis 0
    agg_in = lax.dot_general(A, dis * xw_in, (((0,), (0,)), ((), ())),
                             preferred_element_type=jnp.float32)
    out_in = dis * agg_in + b[:, :f_out]
    # outgoing (flipped) edges
    agg_out = jnp.dot(A, dos * xw_out, preferred_element_type=jnp.float32)
    out_out = dos * agg_out + b[:, f_out:2 * f_out]

    out = 0.5 * out_out + 0.5 * out_in + xw_root + b[:, 2 * f_out:]
    out = jnp.maximum(out, 0.0)        # reference applies F.relu on every layer
    if last:                           # fused log_softmax (no separate launch)
        m = jnp.max(out, axis=-1, keepdims=True)
        s = out - m
        out = s - jnp.log(jnp.sum(jnp.exp(s), axis=-1, keepdims=True))
    o_ref[...] = out


def dir_gcn_apply(x, a_bin, dis, dos, w_cat, b_cat, *, last):
    n, f_in = x.shape
    f_out = w_cat.shape[1] // 3
    resident = 4 * (n * f_in + n * n + 2 * n + f_in * 3 * f_out + 3 * f_out
                    + n * f_out + 3 * n * 3 * f_out)
    kernel = functools.partial(_dir_gcn_kernel, f_out=f_out, last=last)
    # TODO(synk): for graphs whose dense [N,N] adjacency exceeds VMEM, this layer
    # should be row-block tiled (full xw recomputed per block) like the curvature
    # kernels; kept whole-array here since the propagation then reads A only once.
    return pl.pallas_call(
        kernel,
        out_shape=jax.ShapeDtypeStruct((n, f_out), jnp.float32),
        in_specs=[pl.BlockSpec(memory_space=VMEM)] * 6,
        out_specs=pl.BlockSpec(memory_space=VMEM),
        compiler_params=_cp(resident),
    )(x, a_bin, dis, dos, w_cat, b_cat)


# ----------------------------------------------------------------------------
# Plain-JAX glue
# ----------------------------------------------------------------------------
def remove_top_k_neighbors_with_mask(adj, kappa, k_percent):
    n = adj.shape[0]
    num_to_remove = int(n * k_percent / 100)
    mask = jnp.ones((n,), jnp.float32)
    if num_to_remove > 0:
        _, top_idx = lax.top_k(kappa.reshape(-1), num_to_remove)
        mask = mask.at[top_idx].set(0.0)
    return adj * mask[:, None] * mask[None, :]


def dc_dirgnn_forward(params, x, adj, p=30, iterations=2):
    # --- all 4 CurvatureMLP heads (kappa + fn ensemble) in one fused kernel ---
    heads = [params["curv_mlp"]] + list(params["fn_mlps"])
    nhid = heads[0][2].shape[0]
    n_heads = len(heads)
    w1 = jnp.concatenate([h[0] for h in heads], axis=1)       # [F, H*nhid]
    b1 = jnp.concatenate([h[1] for h in heads], axis=1)       # [1, H*nhid]
    w2 = jnp.zeros((n_heads * nhid, n_heads), jnp.float32)    # block-diagonal fc2
    for k, h in enumerate(heads):
        w2 = w2.at[k * nhid:(k + 1) * nhid, k:k + 1].set(h[2])
    b2 = jnp.concatenate([h[3] for h in heads], axis=1)       # [1, H]
    mlp_out = fused_mlp_apply(x, w1, b1, w2, b2)              # [N, H]
    kappa = mlp_out[:, 0:1]                                   # [N, 1]
    f_cols = mlp_out[:, 1:]                                   # [N, num_f]

    # --- curvature regularizer: all fn heads at once, two tiled passes ---
    w_adj, gamma, delta_f = curv_stats_apply(adj, params["weights"], f_cols)
    loss_rows = curv_loss_apply(w_adj, f_cols, gamma, delta_f, jnp.transpose(kappa))
    curv_loss = jnp.sum(loss_rows)

    # --- GNN stack with curvature-based node dropping ---
    h = x
    for t in range(iterations):
        sampled_adj = remove_top_k_neighbors_with_mask(adj, kappa, p * t)
        a_bin = (sampled_adj != 0).astype(jnp.float32)         # edge set = nonzeros
        # degree norms: cheap reductions fused with the masking pass in XLA;
        # avoids materializing A^T anywhere (HBM or VMEM).
        deg_out = jnp.sum(a_bin, axis=1, keepdims=True)
        deg_in = jnp.transpose(jnp.sum(a_bin, axis=0, keepdims=True))
        dis = jnp.where(deg_in > 0, lax.rsqrt(deg_in), 0.0)
        dos = jnp.where(deg_out > 0, lax.rsqrt(deg_out), 0.0)
        w_in, b_in, w_out, b_out, w_root, b_root = params["gnn"][t]
        w_cat = jnp.concatenate([w_in, w_out, w_root], axis=1)  # [F_in, 3*F_out]
        b_cat = jnp.concatenate([b_in, b_out, b_root], axis=1)  # [1, 3*F_out]
        h = dir_gcn_apply(h, a_bin, dis, dos, w_cat, b_cat,
                          last=(t == iterations - 1))
        # TODO(synk): inter-layer F.dropout omitted (module evaluated with training=False).
    return h, 1.0 * curv_loss


# ----------------------------------------------------------------------------
# Deterministic parameter init (shapes follow the PyTorch __init__)
# ----------------------------------------------------------------------------
def _mlp_params(key, nfeat, nhid):
    k1, k2 = jax.random.split(key)
    return (
        0.1 * jax.random.normal(k1, (nfeat, nhid), jnp.float32),
        jnp.zeros((1, nhid), jnp.float32),
        0.1 * jax.random.normal(k2, (nhid, 1), jnp.float32),
        jnp.zeros((1, 1), jnp.float32),
    )


def _gnn_params(key, f_in, f_out):
    k1, k2, k3 = jax.random.split(key, 3)
    return (
        0.1 * jax.random.normal(k1, (f_in, f_out), jnp.float32),
        jnp.zeros((1, f_out), jnp.float32),
        0.1 * jax.random.normal(k2, (f_in, f_out), jnp.float32),
        jnp.zeros((1, f_out), jnp.float32),
        0.1 * jax.random.normal(k3, (f_in, f_out), jnp.float32),
        jnp.zeros((1, f_out), jnp.float32),
    )


def init_params(key, n, nfeat, nhid, nclass, iterations, fn_count=3):
    keys = jax.random.split(key, 2 + fn_count + iterations)
    params = {
        "curv_mlp": _mlp_params(keys[0], nfeat, nhid),
        "weights": jax.random.normal(keys[1], (n, n), jnp.float32),  # randn_like(adj)
        "fn_mlps": [_mlp_params(keys[2 + i], nfeat, nhid) for i in range(fn_count)],
        "gnn": [],
    }
    for i in range(iterations):
        f_in = nfeat if i == 0 else nhid
        f_out = nclass if i == iterations - 1 else nhid
        params["gnn"].append(_gnn_params(keys[2 + fn_count + i], f_in, f_out))
    return params


if __name__ == "__main__":
    N, NFEAT, NHID, NCLASS, ITERS = 32, 16, 32, 8, 2

    key = jax.random.PRNGKey(0)
    kx, ka, kp = jax.random.split(key, 3)

    x = jax.random.normal(kx, (N, NFEAT), jnp.float32)
    adj = (jax.random.uniform(ka, (N, N)) < 0.3).astype(jnp.float32)
    adj = adj * (1.0 - jnp.eye(N, dtype=jnp.float32))   # no self loops in the input graph

    params = init_params(kp, N, NFEAT, NHID, NCLASS, ITERS)

    fwd = jax.jit(functools.partial(dc_dirgnn_forward, p=30, iterations=ITERS))
    logp, curv_loss = fwd(params, x, adj)
    jax.block_until_ready((logp, curv_loss))

    assert logp.shape == (N, NCLASS)
    assert jnp.isfinite(logp).all() and jnp.isfinite(curv_loss)
    print("KERNEL_OK")
</pallas_src>

<mosaic_0001>
module attributes {stable_mosaic.version = 11 : i64} {
  func.func @_fused_mlp_kernel(%arg0: i32, %arg1: memref<32x16xf32, #tpu.memory_space<vmem>>, %arg2: memref<16x128xf32, #tpu.memory_space<vmem>>, %arg3: memref<1x128xf32, #tpu.memory_space<vmem>>, %arg4: memref<128x4xf32, #tpu.memory_space<vmem>>, %arg5: memref<1x4xf32, #tpu.memory_space<vmem>>, %arg6: memref<32x4xf32, #tpu.memory_space<vmem>>) attributes {dimension_semantics = [#tpu.dimension_semantics<parallel>], iteration_bounds = array<i64: 1>, scalar_prefetch = 0 : i64, scratch_operands = 0 : i64, tpu.core_type = #tpu.core_type<tc>, window_params = [{transform_indices = @transform_0, window_bounds = array<i64: 32, 16>}, {pipeline_mode = #tpu.pipeline_mode<synchronous>, transform_indices = @transform_1, window_bounds = array<i64: 16, 128>}, {pipeline_mode = #tpu.pipeline_mode<synchronous>, transform_indices = @transform_2, window_bounds = array<i64: 1, 128>}, {pipeline_mode = #tpu.pipeline_mode<synchronous>, transform_indices = @transform_3, window_bounds = array<i64: 128, 4>}, {pipeline_mode = #tpu.pipeline_mode<synchronous>, transform_indices = @transform_4, window_bounds = array<i64: 1, 4>}, {transform_indices = @transform_5, window_bounds = array<i64: 32, 4>}]} {
    %c0 = arith.constant 0 : index
    %c0_0 = arith.constant 0 : index
    %0 = vector.load %arg1[%c0, %c0_0] : memref<32x16xf32, #tpu.memory_space<vmem>>, vector<32x16xf32>
    %c0_1 = arith.constant 0 : index
    %c0_2 = arith.constant 0 : index
    %1 = vector.load %arg2[%c0_1, %c0_2] : memref<16x128xf32, #tpu.memory_space<vmem>>, vector<16x128xf32>
    %cst = arith.constant dense<0.000000e+00> : vector<32x128xf32>
    %2 = tpu.matmul %0, %1, %cst {dimension_numbers = #tpu.dot_dimension_numbers<[1], [0], [0], [1], [0, 0, 1, 1], [], []>} : vector<32x16xf32>, vector<16x128xf32>, vector<32x128xf32> -> vector<32x128xf32>
    %c0_3 = arith.constant 0 : index
    %c0_4 = arith.constant 0 : index
    %3 = vector.load %arg3[%c0_3, %c0_4] : memref<1x128xf32, #tpu.memory_space<vmem>>, vector<1x128xf32>
    %4 = vector.broadcast %3 : vector<1x128xf32> to vector<32x128xf32>
    %5 = arith.addf %2, %4 : vector<32x128xf32>
    %cst_5 = arith.constant 0.000000e+00 : f32
    %6 = vector.broadcast %cst_5 : f32 to vector<32x128xf32>
    %7 = arith.maximumf %5, %6 : vector<32x128xf32>
    %c0_6 = arith.constant 0 : index
    %c0_7 = arith.constant 0 : index
    %8 = vector.load %arg4[%c0_6, %c0_7] : memref<128x4xf32, #tpu.memory_space<vmem>>, vector<128x4xf32>
    %cst_8 = arith.constant dense<0.000000e+00> : vector<32x4xf32>
    %9 = tpu.matmul %7, %8, %cst_8 {dimension_numbers = #tpu.dot_dimension_numbers<[1], [0], [0], [1], [0, 0, 1, 1], [], []>} : vector<32x128xf32>, vector<128x4xf32>, vector<32x4xf32> -> vector<32x4xf32>
    %c0_9 = arith.constant 0 : index
    %c0_10 = arith.constant 0 : index
    %10 = vector.load %arg5[%c0_9, %c0_10] : memref<1x4xf32, #tpu.memory_space<vmem>>, vector<1x4xf32>
    %11 = vector.broadcast %10 : vector<1x4xf32> to vector<32x4xf32>
    %12 = arith.addf %9, %11 : vector<32x4xf32>
    %13 = arith.negf %12 : vector<32x4xf32>
    %14 = math.exp %13 : vector<32x4xf32>
    %cst_11 = arith.constant 1.000000e+00 : f32
    %15 = vector.broadcast %cst_11 : f32 to vector<32x4xf32>
    %16 = arith.addf %15, %14 : vector<32x4xf32>
    %17 = arith.divf %15, %16 : vector<32x4xf32>
    %c0_12 = arith.constant 0 : index
    %c0_13 = arith.constant 0 : index
    %18 = vector.load %arg6[%c0_12, %c0_13] : memref<32x4xf32, #tpu.memory_space<vmem>>, vector<32x4xf32>
    tpu.vector_store %arg6[%c0_12, %c0_13], %17 {strides = array<i32>} : memref<32x4xf32, #tpu.memory_space<vmem>>, vector<32x4xf32>,
    return
  }
  func.func @transform_0(%arg0: i32) -> (i32, i32) {
    %c0_i32 = arith.constant 0 : i32
    %c0_i32_0 = arith.constant 0 : i32
    return %arg0, %c0_i32 : i32, i32
  }
  func.func @transform_1(%arg0: i32) -> (i32, i32) {
    %c0_i32 = arith.constant 0 : i32
    %c0_i32_0 = arith.constant 0 : i32
    %c0_i32_1 = arith.constant 0 : i32
    return %c0_i32, %c0_i32_0 : i32, i32
  }
  func.func @transform_2(%arg0: i32) -> (i32, i32) {
    %c0_i32 = arith.constant 0 : i32
    %c0_i32_0 = arith.constant 0 : i32
    %c0_i32_1 = arith.constant 0 : i32
    return %c0_i32, %c0_i32_0 : i32, i32
  }
  func.func @transform_3(%arg0: i32) -> (i32, i32) {
    %c0_i32 = arith.constant 0 : i32
    %c0_i32_0 = arith.constant 0 : i32
    %c0_i32_1 = arith.constant 0 : i32
    return %c0_i32, %c0_i32_0 : i32, i32
  }
  func.func @transform_4(%arg0: i32) -> (i32, i32) {
    %c0_i32 = arith.constant 0 : i32
    %c0_i32_0 = arith.constant 0 : i32
    %c0_i32_1 = arith.constant 0 : i32
    return %c0_i32, %c0_i32_0 : i32, i32
  }
  func.func @transform_5(%arg0: i32) -> (i32, i32) {
    %c0_i32 = arith.constant 0 : i32
    %c0_i32_0 = arith.constant 0 : i32
    return %arg0, %c0_i32 : i32, i32
  }
}

module attributes {stable_mosaic.version = 11 : i64} {
  func.func @_dir_gcn_kernel(%arg0: memref<32x16xf32, #tpu.memory_space<vmem>>, %arg1: memref<32x32xf32, #tpu.memory_space<vmem>>, %arg2: memref<32x1xf32, #tpu.memory_space<vmem>>, %arg3: memref<32x1xf32, #tpu.memory_space<vmem>>, %arg4: memref<16x96xf32, #tpu.memory_space<vmem>>, %arg5: memref<1x96xf32, #tpu.memory_space<vmem>>, %arg6: memref<32x32xf32, #tpu.memory_space<vmem>>) attributes {dimension_semantics = [], scalar_prefetch = 0 : i64, scratch_operands = 0 : i64, tpu.core_type = #tpu.core_type<tc>} {
    %c0 = arith.constant 0 : index
    %c0_0 = arith.constant 0 : index
    %0 = vector.load %arg0[%c0, %c0_0] : memref<32x16xf32, #tpu.memory_space<vmem>>, vector<32x16xf32>
    %c0_1 = arith.constant 0 : index
    %c0_2 = arith.constant 0 : index
    %1 = vector.load %arg1[%c0_1, %c0_2] : memref<32x32xf32, #tpu.memory_space<vmem>>, vector<32x32xf32>
    %c0_3 = arith.constant 0 : index
    %c0_4 = arith.constant 0 : index
    %2 = vector.load %arg2[%c0_3, %c0_4] : memref<32x1xf32, #tpu.memory_space<vmem>>, vector<32x1xf32>
    %c0_5 = arith.constant 0 : index
    %c0_6 = arith.constant 0 : index
    %3 = vector.load %arg3[%c0_5, %c0_6] : memref<32x1xf32, #tpu.memory_space<vmem>>, vector<32x1xf32>
    %c0_7 = arith.constant 0 : index
    %c0_8 = arith.constant 0 : index
    %4 = vector.load %arg5[%c0_7, %c0_8] : memref<1x96xf32, #tpu.memory_space<vmem>>, vector<1x96xf32>
    %c0_9 = arith.constant 0 : index
    %c0_10 = arith.constant 0 : index
    %5 = vector.load %arg4[%c0_9, %c0_10] : memref<16x96xf32, #tpu.memory_space<vmem>>, vector<16x96xf32>
    %cst = arith.constant dense<0.000000e+00> : vector<32x96xf32>
    %6 = tpu.matmul %0, %5, %cst {dimension_numbers = #tpu.dot_dimension_numbers<[1], [0], [0], [1], [0, 0, 1, 1], [], []>} : vector<32x16xf32>, vector<16x96xf32>, vector<32x96xf32> -> vector<32x96xf32>
    %7 = vector.extract_strided_slice %6 {offsets = [0, 0], sizes = [32, 32], strides = [1, 1]} : vector<32x96xf32> to vector<32x32xf32>
    %8 = vector.extract_strided_slice %6 {offsets = [0, 32], sizes = [32, 32], strides = [1, 1]} : vector<32x96xf32> to vector<32x32xf32>
    %9 = vector.extract_strided_slice %6 {offsets = [0, 64], sizes = [32, 32], strides = [1, 1]} : vector<32x96xf32> to vector<32x32xf32>
    %10 = vector.broadcast %2 : vector<32x1xf32> to vector<32x32xf32>
    %11 = arith.mulf %10, %7 : vector<32x32xf32>
    %cst_11 = arith.constant dense<0.000000e+00> : vector<32x32xf32>
    %12 = tpu.matmul %1, %11, %cst_11 {dimension_numbers = #tpu.dot_dimension_numbers<[0], [0], [1], [1], [0, 1, 1, 1], [], []>} : vector<32x32xf32>, vector<32x32xf32>, vector<32x32xf32> -> vector<32x32xf32>
    %13 = vector.broadcast %2 : vector<32x1xf32> to vector<32x32xf32>
    %14 = arith.mulf %13, %12 : vector<32x32xf32>
    %15 = vector.extract_strided_slice %4 {offsets = [0, 0], sizes = [1, 32], strides = [1, 1]} : vector<1x96xf32> to vector<1x32xf32>
    %16 = vector.broadcast %15 : vector<1x32xf32> to vector<32x32xf32>
    %17 = arith.addf %14, %16 : vector<32x32xf32>
    %18 = vector.broadcast %3 : vector<32x1xf32> to vector<32x32xf32>
    %19 = arith.mulf %18, %8 : vector<32x32xf32>
    %cst_12 = arith.constant dense<0.000000e+00> : vector<32x32xf32>
    %20 = tpu.matmul %1, %19, %cst_12 {dimension_numbers = #tpu.dot_dimension_numbers<[1], [0], [0], [1], [0, 0, 1, 1], [], []>} : vector<32x32xf32>, vector<32x32xf32>, vector<32x32xf32> -> vector<32x32xf32>
    %21 = vector.broadcast %3 : vector<32x1xf32> to vector<32x32xf32>
    %22 = arith.mulf %21, %20 : vector<32x32xf32>
    %23 = vector.extract_strided_slice %4 {offsets = [0, 32], sizes = [1, 32], strides = [1, 1]} : vector<1x96xf32> to vector<1x32xf32>
    %24 = vector.broadcast %23 : vector<1x32xf32> to vector<32x32xf32>
    %25 = arith.addf %22, %24 : vector<32x32xf32>
    %cst_13 = arith.constant 5.000000e-01 : f32
    %26 = vector.broadcast %cst_13 : f32 to vector<32x32xf32>
    %27 = arith.mulf %26, %25 : vector<32x32xf32>
    %cst_14 = arith.constant 5.000000e-01 : f32
    %28 = vector.broadcast %cst_14 : f32 to vector<32x32xf32>
    %29 = arith.mulf %28, %17 : vector<32x32xf32>
    %30 = arith.addf %27, %29 : vector<32x32xf32>
    %31 = arith.addf %30, %9 : vector<32x32xf32>
    %32 = vector.extract_strided_slice %4 {offsets = [0, 64], sizes = [1, 32], strides = [1, 1]} : vector<1x96xf32> to vector<1x32xf32>
    %33 = vector.broadcast %32 : vector<1x32xf32> to vector<32x32xf32>
    %34 = arith.addf %31, %33 : vector<32x32xf32>
    %cst_15 = arith.constant 0.000000e+00 : f32
    %35 = vector.broadcast %cst_15 : f32 to vector<32x32xf32>
    %36 = arith.maximumf %34, %35 : vector<32x32xf32>
    %c0_16 = arith.constant 0 : index
    %c0_17 = arith.constant 0 : index
    %37 = vector.load %arg6[%c0_16, %c0_17] : memref<32x32xf32, #tpu.memory_space<vmem>>, vector<32x32xf32>
    tpu.vector_store %arg6[%c0_16, %c0_17], %36 {strides = array<i32>} : memref<32x32xf32, #tpu.memory_space<vmem>>, vector<32x32xf32>,
    return
  }
}

module attributes {stable_mosaic.version = 11 : i64} {
  func.func @_dir_gcn_kernel(%arg0: memref<32x32xf32, #tpu.memory_space<vmem>>, %arg1: memref<32x32xf32, #tpu.memory_space<vmem>>, %arg2: memref<32x1xf32, #tpu.memory_space<vmem>>, %arg3: memref<32x1xf32, #tpu.memory_space<vmem>>, %arg4: memref<32x24xf32, #tpu.memory_space<vmem>>, %arg5: memref<1x24xf32, #tpu.memory_space<vmem>>, %arg6: memref<32x8xf32, #tpu.memory_space<vmem>>) attributes {dimension_semantics = [], scalar_prefetch = 0 : i64, scratch_operands = 0 : i64, tpu.core_type = #tpu.core_type<tc>} {
    %c0 = arith.constant 0 : index
    %c0_0 = arith.constant 0 : index
    %0 = vector.load %arg0[%c0, %c0_0] : memref<32x32xf32, #tpu.memory_space<vmem>>, vector<32x32xf32>
    %c0_1 = arith.constant 0 : index
    %c0_2 = arith.constant 0 : index
    %1 = vector.load %arg1[%c0_1, %c0_2] : memref<32x32xf32, #tpu.memory_space<vmem>>, vector<32x32xf32>
    %c0_3 = arith.constant 0 : index
    %c0_4 = arith.constant 0 : index
    %2 = vector.load %arg2[%c0_3, %c0_4] : memref<32x1xf32, #tpu.memory_space<vmem>>, vector<32x1xf32>
    %c0_5 = arith.constant 0 : index
    %c0_6 = arith.constant 0 : index
    %3 = vector.load %arg3[%c0_5, %c0_6] : memref<32x1xf32, #tpu.memory_space<vmem>>, vector<32x1xf32>
    %c0_7 = arith.constant 0 : index
    %c0_8 = arith.constant 0 : index
    %4 = vector.load %arg5[%c0_7, %c0_8] : memref<1x24xf32, #tpu.memory_space<vmem>>, vector<1x24xf32>
    %c0_9 = arith.constant 0 : index
    %c0_10 = arith.constant 0 : index
    %5 = vector.load %arg4[%c0_9, %c0_10] : memref<32x24xf32, #tpu.memory_space<vmem>>, vector<32x24xf32>
    %cst = arith.constant dense<0.000000e+00> : vector<32x24xf32>
    %6 = tpu.matmul %0, %5, %cst {dimension_numbers = #tpu.dot_dimension_numbers<[1], [0], [0], [1], [0, 0, 1, 1], [], []>} : vector<32x32xf32>, vector<32x24xf32>, vector<32x24xf32> -> vector<32x24xf32>
    %7 = vector.extract_strided_slice %6 {offsets = [0, 0], sizes = [32, 8], strides = [1, 1]} : vector<32x24xf32> to vector<32x8xf32>
    %8 = vector.extract_strided_slice %6 {offsets = [0, 8], sizes = [32, 8], strides = [1, 1]} : vector<32x24xf32> to vector<32x8xf32>
    %9 = vector.extract_strided_slice %6 {offsets = [0, 16], sizes = [32, 8], strides = [1, 1]} : vector<32x24xf32> to vector<32x8xf32>
    %10 = vector.broadcast %2 : vector<32x1xf32> to vector<32x8xf32>
    %11 = arith.mulf %10, %7 : vector<32x8xf32>
    %cst_11 = arith.constant dense<0.000000e+00> : vector<32x8xf32>
    %12 = tpu.matmul %1, %11, %cst_11 {dimension_numbers = #tpu.dot_dimension_numbers<[0], [0], [1], [1], [0, 1, 1, 1], [], []>} : vector<32x32xf32>, vector<32x8xf32>, vector<32x8xf32> -> vector<32x8xf32>
    %13 = vector.broadcast %2 : vector<32x1xf32> to vector<32x8xf32>
    %14 = arith.mulf %13, %12 : vector<32x8xf32>
    %15 = vector.extract_strided_slice %4 {offsets = [0, 0], sizes = [1, 8], strides = [1, 1]} : vector<1x24xf32> to vector<1x8xf32>
    %16 = vector.broadcast %15 : vector<1x8xf32> to vector<32x8xf32>
    %17 = arith.addf %14, %16 : vector<32x8xf32>
    %18 = vector.broadcast %3 : vector<32x1xf32> to vector<32x8xf32>
    %19 = arith.mulf %18, %8 : vector<32x8xf32>
    %cst_12 = arith.constant dense<0.000000e+00> : vector<32x8xf32>
    %20 = tpu.matmul %1, %19, %cst_12 {dimension_numbers = #tpu.dot_dimension_numbers<[1], [0], [0], [1], [0, 0, 1, 1], [], []>} : vector<32x32xf32>, vector<32x8xf32>, vector<32x8xf32> -> vector<32x8xf32>
    %21 = vector.broadcast %3 : vector<32x1xf32> to vector<32x8xf32>
    %22 = arith.mulf %21, %20 : vector<32x8xf32>
    %23 = vector.extract_strided_slice %4 {offsets = [0, 8], sizes = [1, 8], strides = [1, 1]} : vector<1x24xf32> to vector<1x8xf32>
    %24 = vector.broadcast %23 : vector<1x8xf32> to vector<32x8xf32>
    %25 = arith.addf %22, %24 : vector<32x8xf32>
    %cst_13 = arith.constant 5.000000e-01 : f32
    %26 = vector.broadcast %cst_13 : f32 to vector<32x8xf32>
    %27 = arith.mulf %26, %25 : vector<32x8xf32>
    %cst_14 = arith.constant 5.000000e-01 : f32
    %28 = vector.broadcast %cst_14 : f32 to vector<32x8xf32>
    %29 = arith.mulf %28, %17 : vector<32x8xf32>
    %30 = arith.addf %27, %29 : vector<32x8xf32>
    %31 = arith.addf %30, %9 : vector<32x8xf32>
    %32 = vector.extract_strided_slice %4 {offsets = [0, 16], sizes = [1, 8], strides = [1, 1]} : vector<1x24xf32> to vector<1x8xf32>
    %33 = vector.broadcast %32 : vector<1x8xf32> to vector<32x8xf32>
    %34 = arith.addf %31, %33 : vector<32x8xf32>
    %cst_15 = arith.constant 0.000000e+00 : f32
    %35 = vector.broadcast %cst_15 : f32 to vector<32x8xf32>
    %36 = arith.maximumf %34, %35 : vector<32x8xf32>
    %cst_16 = arith.constant dense<0xFF800000> : vector<32xf32>
    %37 = vector.multi_reduction <maximumf>, %36, %cst_16 [1] : vector<32x8xf32> to vector<32xf32>
    %38 = vector.shape_cast %37 : vector<32xf32> to vector<32x1xf32>
    %39 = vector.broadcast %38 : vector<32x1xf32> to vector<32x8xf32>
    %40 = arith.subf %36, %39 : vector<32x8xf32>
    %41 = math.exp %40 : vector<32x8xf32>
    %cst_17 = arith.constant dense<0.000000e+00> : vector<32xf32>
    %42 = vector.multi_reduction <add>, %41, %cst_17 [1] : vector<32x8xf32> to vector<32xf32>
    %43 = vector.shape_cast %42 : vector<32xf32> to vector<32x1xf32>
    %44 = math.log %43 : vector<32x1xf32>
    %45 = vector.broadcast %44 : vector<32x1xf32> to vector<32x8xf32>
    %46 = arith.subf %40, %45 : vector<32x8xf32>
    %c0_18 = arith.constant 0 : index
    %c0_19 = arith.constant 0 : index
    %47 = vector.load %arg6[%c0_18, %c0_19] : memref<32x8xf32, #tpu.memory_space<vmem>>, vector<32x8xf32>
    tpu.vector_store %arg6[%c0_18, %c0_19], %46 {strides = array<i32>} : memref<32x8xf32, #tpu.memory_space<vmem>>, vector<32x8xf32>,
    return
  }
}

module attributes {stable_mosaic.version = 11 : i64} {
  func.func @_curv_loss_kernel(%arg0: i32, %arg1: memref<32x32xf32, #tpu.memory_space<vmem>>, %arg2: memref<32x3xf32, #tpu.memory_space<vmem>>, %arg3: memref<32x3xf32, #tpu.memory_space<vmem>>, %arg4: memref<32x3xf32, #tpu.memory_space<vmem>>, %arg5: memref<1x32xf32, #tpu.memory_space<vmem>>, %arg6: memref<32x1xf32, #tpu.memory_space<vmem>>) attributes {dimension_semantics = [#tpu.dimension_semantics<parallel>], iteration_bounds = array<i64: 1>, scalar_prefetch = 0 : i64, scratch_operands = 0 : i64, tpu.core_type = #tpu.core_type<tc>, window_params = [{transform_indices = @transform_0, window_bounds = array<i64: 32, 32>}, {pipeline_mode = #tpu.pipeline_mode<synchronous>, transform_indices = @transform_1, window_bounds = array<i64: 32, 3>}, {pipeline_mode = #tpu.pipeline_mode<synchronous>, transform_indices = @transform_2, window_bounds = array<i64: 32, 3>}, {pipeline_mode = #tpu.pipeline_mode<synchronous>, transform_indices = @transform_3, window_bounds = array<i64: 32, 3>}, {pipeline_mode = #tpu.pipeline_mode<synchronous>, transform_indices = @transform_4, window_bounds = array<i64: 1, 32>}, {transform_indices = @transform_5, window_bounds = array<i64: 32, 1>}]} {
    %c32_i32 = arith.constant 32 : i32
    %0 = arith.muli %arg0, %c32_i32 : i32
    %c0 = arith.constant 0 : index
    %c0_0 = arith.constant 0 : index
    %1 = vector.load %arg1[%c0, %c0_0] : memref<32x32xf32, #tpu.memory_space<vmem>>, vector<32x32xf32>
    %cst = arith.constant dense<0.000000e+00> : vector<32xf32>
    %2 = vector.multi_reduction <add>, %1, %cst [1] : vector<32x32xf32> to vector<32xf32>
    %3 = vector.shape_cast %2 : vector<32xf32> to vector<32x1xf32>
    %c0_1 = arith.constant 0 : index
    %c0_2 = arith.constant 0 : index
    %4 = vector.load %arg2[%c0_1, %c0_2] : memref<32x3xf32, #tpu.memory_space<vmem>>, vector<32x3xf32>
    %c0_3 = arith.constant 0 : index
    %c0_4 = arith.constant 0 : index
    %5 = vector.load %arg3[%c0_3, %c0_4] : memref<32x3xf32, #tpu.memory_space<vmem>>, vector<32x3xf32>
    %c0_5 = arith.constant 0 : index
    %c0_6 = arith.constant 0 : index
    %6 = vector.load %arg4[%c0_5, %c0_6] : memref<32x3xf32, #tpu.memory_space<vmem>>, vector<32x3xf32>
    %7 = arith.index_cast %0 : i32 to index
    %c0_7 = arith.constant 0 : index
    %8 = vector.load %arg2[%7, %c0_7] : memref<32x3xf32, #tpu.memory_space<vmem>>, vector<32x3xf32>
    %9 = arith.index_cast %0 : i32 to index
    %c0_8 = arith.constant 0 : index
    %10 = vector.load %arg3[%9, %c0_8] : memref<32x3xf32, #tpu.memory_space<vmem>>, vector<32x3xf32>
    %11 = arith.index_cast %0 : i32 to index
    %c0_9 = arith.constant 0 : index
    %12 = vector.load %arg4[%11, %c0_9] : memref<32x3xf32, #tpu.memory_space<vmem>>, vector<32x3xf32>
    %13 = arith.mulf %4, %6 : vector<32x3xf32>
    %14 = tpu.concatenate %5, %6, %13 in 1 : vector<32x3xf32>, vector<32x3xf32>, vector<32x3xf32> -> vector<32x9xf32>
    %cst_10 = arith.constant dense<0.000000e+00> : vector<32x9xf32>
    %15 = tpu.matmul %1, %14, %cst_10 {dimension_numbers = #tpu.dot_dimension_numbers<[1], [0], [0], [1], [0, 0, 1, 1], [], []>} : vector<32x32xf32>, vector<32x9xf32>, vector<32x9xf32> -> vector<32x9xf32>
    %16 = vector.extract_strided_slice %15 {offsets = [0, 0], sizes = [32, 3], strides = [1, 1]} : vector<32x9xf32> to vector<32x3xf32>
    %17 = vector.extract_strided_slice %15 {offsets = [0, 3], sizes = [32, 3], strides = [1, 1]} : vector<32x9xf32> to vector<32x3xf32>
    %18 = vector.extract_strided_slice %15 {offsets = [0, 6], sizes = [32, 3], strides = [1, 1]} : vector<32x9xf32> to vector<32x3xf32>
    %19 = vector.broadcast %3 : vector<32x1xf32> to vector<32x3xf32>
    %20 = arith.mulf %19, %8 : vector<32x3xf32>
    %21 = arith.addf %12, %20 : vector<32x3xf32>
    %22 = vector.broadcast %3 : vector<32x1xf32> to vector<32x3xf32>
    %23 = arith.mulf %22, %10 : vector<32x3xf32>
    %24 = arith.subf %16, %23 : vector<32x3xf32>
    %25 = arith.mulf %8, %17 : vector<32x3xf32>
    %26 = arith.subf %18, %25 : vector<32x3xf32>
    %27 = arith.mulf %12, %21 : vector<32x3xf32>
    %28 = arith.subf %26, %27 : vector<32x3xf32>
    %29 = vector.broadcast %3 : vector<32x1xf32> to vector<32x3xf32>
    %30 = arith.mulf %29, %8 : vector<32x3xf32>
    %31 = arith.mulf %30, %12 : vector<32x3xf32>
    %32 = arith.addf %28, %31 : vector<32x3xf32>
    %cst_11 = arith.constant 5.000000e-01 : f32
    %33 = vector.broadcast %cst_11 : f32 to vector<32x3xf32>
    %34 = arith.mulf %33, %32 : vector<32x3xf32>
    %cst_12 = arith.constant 5.000000e-01 : f32
    %35 = vector.broadcast %cst_12 : f32 to vector<32x3xf32>
    %36 = arith.mulf %35, %24 : vector<32x3xf32>
    %37 = arith.subf %36, %34 : vector<32x3xf32>
    %c0_13 = arith.constant 0 : index
    %c0_14 = arith.constant 0 : index
    %38 = vector.load %arg5[%c0_13, %c0_14] : memref<1x32xf32, #tpu.memory_space<vmem>>, vector<1x32xf32>
    %cst_15 = arith.constant 0.000000e+00 : f32
    %39 = vector.broadcast %cst_15 : f32 to vector<32x1xf32>
    %40 = vector.extract_strided_slice %10 {offsets = [0, 0], sizes = [32, 1], strides = [1, 1]} : vector<32x3xf32> to vector<32x1xf32>
    %41 = vector.broadcast %40 : vector<32x1xf32> to vector<32x32xf32>
    %42 = vector.broadcast %38 : vector<1x32xf32> to vector<32x32xf32>
    %43 = arith.mulf %41, %42 : vector<32x32xf32>
    %44 = vector.extract_strided_slice %37 {offsets = [0, 0], sizes = [32, 1], strides = [1, 1]} : vector<32x3xf32> to vector<32x1xf32>
    %45 = vector.broadcast %44 : vector<32x1xf32> to vector<32x32xf32>
    %46 = arith.subf %43, %45 : vector<32x32xf32>
    %cst_16 = arith.constant 0.000000e+00 : f32
    %47 = vector.broadcast %cst_16 : f32 to vector<32x32xf32>
    %48 = arith.maximumf %46, %47 : vector<32x32xf32>
    %cst_17 = arith.constant dense<0.000000e+00> : vector<32xf32>
    %49 = vector.multi_reduction <add>, %48, %cst_17 [1] : vector<32x32xf32> to vector<32xf32>
    %50 = vector.shape_cast %49 : vector<32xf32> to vector<32x1xf32>
    %51 = arith.addf %39, %50 : vector<32x1xf32>
    %52 = vector.extract_strided_slice %10 {offsets = [0, 1], sizes = [32, 1], strides = [1, 1]} : vector<32x3xf32> to vector<32x1xf32>
    %53 = vector.broadcast %52 : vector<32x1xf32> to vector<32x32xf32>
    %54 = vector.broadcast %38 : vector<1x32xf32> to vector<32x32xf32>
    %55 = arith.mulf %53, %54 : vector<32x32xf32>
    %56 = vector.extract_strided_slice %37 {offsets = [0, 1], sizes = [32, 1], strides = [1, 1]} : vector<32x3xf32> to vector<32x1xf32>
    %57 = vector.broadcast %56 : vector<32x1xf32> to vector<32x32xf32>
    %58 = arith.subf %55, %57 : vector<32x32xf32>
    %cst_18 = arith.constant 0.000000e+00 : f32
    %59 = vector.broadcast %cst_18 : f32 to vector<32x32xf32>
    %60 = arith.maximumf %58, %59 : vector<32x32xf32>
    %cst_19 = arith.constant dense<0.000000e+00> : vector<32xf32>
    %61 = vector.multi_reduction <add>, %60, %cst_19 [1] : vector<32x32xf32> to vector<32xf32>
    %62 = vector.shape_cast %61 : vector<32xf32> to vector<32x1xf32>
    %63 = arith.addf %51, %62 : vector<32x1xf32>
    %64 = vector.extract_strided_slice %10 {offsets = [0, 2], sizes = [32, 1], strides = [1, 1]} : vector<32x3xf32> to vector<32x1xf32>
    %65 = vector.broadcast %64 : vector<32x1xf32> to vector<32x32xf32>
    %66 = vector.broadcast %38 : vector<1x32xf32> to vector<32x32xf32>
    %67 = arith.mulf %65, %66 : vector<32x32xf32>
    %68 = vector.extract_strided_slice %37 {offsets = [0, 2], sizes = [32, 1], strides = [1, 1]} : vector<32x3xf32> to vector<32x1xf32>
    %69 = vector.broadcast %68 : vector<32x1xf32> to vector<32x32xf32>
    %70 = arith.subf %67, %69 : vector<32x32xf32>
    %cst_20 = arith.constant 0.000000e+00 : f32
    %71 = vector.broadcast %cst_20 : f32 to vector<32x32xf32>
    %72 = arith.maximumf %70, %71 : vector<32x32xf32>
    %cst_21 = arith.constant dense<0.000000e+00> : vector<32xf32>
    %73 = vector.multi_reduction <add>, %72, %cst_21 [1] : vector<32x32xf32> to vector<32xf32>
    %74 = vector.shape_cast %73 : vector<32xf32> to vector<32x1xf32>
    %75 = arith.addf %63, %74 : vector<32x1xf32>
    %c0_22 = arith.constant 0 : index
    %c0_23 = arith.constant 0 : index
    %76 = vector.load %arg6[%c0_22, %c0_23] : memref<32x1xf32, #tpu.memory_space<vmem>>, vector<32x1xf32>
    tpu.vector_store %arg6[%c0_22, %c0_23], %75 {strides = array<i32>} : memref<32x1xf32, #tpu.memory_space<vmem>>, vector<32x1xf32>,
    return
  }
  func.func @transform_0(%arg0: i32) -> (i32, i32) {
    %c0_i32 = arith.constant 0 : i32
    %c0_i32_0 = arith.constant 0 : i32
    return %arg0, %c0_i32 : i32, i32
  }
  func.func @transform_1(%arg0: i32) -> (i32, i32) {
    %c0_i32 = arith.constant 0 : i32
    %c0_i32_0 = arith.constant 0 : i32
    %c0_i32_1 = arith.constant 0 : i32
    return %c0_i32, %c0_i32_0 : i32, i32
  }
  func.func @transform_2(%arg0: i32) -> (i32, i32) {
    %c0_i32 = arith.constant 0 : i32
    %c0_i32_0 = arith.constant 0 : i32
    %c0_i32_1 = arith.constant 0 : i32
    return %c0_i32, %c0_i32_0 : i32, i32
  }
  func.func @transform_3(%arg0: i32) -> (i32, i32) {
    %c0_i32 = arith.constant 0 : i32
    %c0_i32_0 = arith.constant 0 : i32
    %c0_i32_1 = arith.constant 0 : i32
    return %c0_i32, %c0_i32_0 : i32, i32
  }
  func.func @transform_4(%arg0: i32) -> (i32, i32) {
    %c0_i32 = arith.constant 0 : i32
    %c0_i32_0 = arith.constant 0 : i32
    %c0_i32_1 = arith.constant 0 : i32
    return %c0_i32, %c0_i32_0 : i32, i32
  }
  func.func @transform_5(%arg0: i32) -> (i32, i32) {
    %c0_i32 = arith.constant 0 : i32
    %c0_i32_0 = arith.constant 0 : i32
    return %arg0, %c0_i32 : i32, i32
  }
}

module attributes {stable_mosaic.version = 11 : i64} {
  func.func @_curv_stats_kernel(%arg0: i32, %arg1: memref<32x32xf32, #tpu.memory_space<vmem>>, %arg2: memref<32x32xf32, #tpu.memory_space<vmem>>, %arg3: memref<32x3xf32, #tpu.memory_space<vmem>>, %arg4: memref<32x32xf32, #tpu.memory_space<vmem>>, %arg5: memref<32x3xf32, #tpu.memory_space<vmem>>, %arg6: memref<32x3xf32, #tpu.memory_space<vmem>>) attributes {dimension_semantics = [#tpu.dimension_semantics<parallel>], iteration_bounds = array<i64: 1>, scalar_prefetch = 0 : i64, scratch_operands = 0 : i64, tpu.core_type = #tpu.core_type<tc>, window_params = [{transform_indices = @transform_0, window_bounds = array<i64: 32, 32>}, {transform_indices = @transform_1, window_bounds = array<i64: 32, 32>}, {pipeline_mode = #tpu.pipeline_mode<synchronous>, transform_indices = @transform_2, window_bounds = array<i64: 32, 3>}, {transform_indices = @transform_3, window_bounds = array<i64: 32, 32>}, {transform_indices = @transform_4, window_bounds = array<i64: 32, 3>}, {transform_indices = @transform_5, window_bounds = array<i64: 32, 3>}]} {
    %c32_i32 = arith.constant 32 : i32
    %0 = arith.muli %arg0, %c32_i32 : i32
    %c0 = arith.constant 0 : index
    %c0_0 = arith.constant 0 : index
    %1 = vector.load %arg1[%c0, %c0_0] : memref<32x32xf32, #tpu.memory_space<vmem>>, vector<32x32xf32>
    %c0_1 = arith.constant 0 : index
    %c0_2 = arith.constant 0 : index
    %2 = vector.load %arg2[%c0_1, %c0_2] : memref<32x32xf32, #tpu.memory_space<vmem>>, vector<32x32xf32>
    %3 = arith.negf %2 : vector<32x32xf32>
    %4 = math.exp %3 : vector<32x32xf32>
    %cst = arith.constant 1.000000e+00 : f32
    %5 = vector.broadcast %cst : f32 to vector<32x32xf32>
    %6 = arith.addf %5, %4 : vector<32x32xf32>
    %7 = arith.divf %5, %6 : vector<32x32xf32>
    %8 = arith.mulf %1, %7 : vector<32x32xf32>
    %c0_3 = arith.constant 0 : index
    %c0_4 = arith.constant 0 : index
    %9 = vector.load %arg4[%c0_3, %c0_4] : memref<32x32xf32, #tpu.memory_space<vmem>>, vector<32x32xf32>
    tpu.vector_store %arg4[%c0_3, %c0_4], %8 {strides = array<i32>} : memref<32x32xf32, #tpu.memory_space<vmem>>, vector<32x32xf32>,
    %cst_5 = arith.constant dense<0.000000e+00> : vector<32xf32>
    %10 = vector.multi_reduction <add>, %8, %cst_5 [1] : vector<32x32xf32> to vector<32xf32>
    %11 = vector.shape_cast %10 : vector<32xf32> to vector<32x1xf32>
    %c0_6 = arith.constant 0 : index
    %c0_7 = arith.constant 0 : index
    %12 = vector.load %arg3[%c0_6, %c0_7] : memref<32x3xf32, #tpu.memory_space<vmem>>, vector<32x3xf32>
    %13 = arith.index_cast %0 : i32 to index
    %c0_8 = arith.constant 0 : index
    %14 = vector.load %arg3[%13, %c0_8] : memref<32x3xf32, #tpu.memory_space<vmem>>, vector<32x3xf32>
    %15 = arith.mulf %12, %12 : vector<32x3xf32>
    %16 = tpu.concatenate %12, %15 in 1 : vector<32x3xf32>, vector<32x3xf32> -> vector<32x6xf32>
    %cst_9 = arith.constant dense<0.000000e+00> : vector<32x6xf32>
    %17 = tpu.matmul %8, %16, %cst_9 {dimension_numbers = #tpu.dot_dimension_numbers<[1], [0], [0], [1], [0, 0, 1, 1], [], []>} : vector<32x32xf32>, vector<32x6xf32>, vector<32x6xf32> -> vector<32x6xf32>
    %18 = vector.extract_strided_slice %17 {offsets = [0, 0], sizes = [32, 3], strides = [1, 1]} : vector<32x6xf32> to vector<32x3xf32>
    %19 = vector.extract_strided_slice %17 {offsets = [0, 3], sizes = [32, 3], strides = [1, 1]} : vector<32x6xf32> to vector<32x3xf32>
    %20 = vector.broadcast %11 : vector<32x1xf32> to vector<32x3xf32>
    %21 = arith.mulf %20, %14 : vector<32x3xf32>
    %22 = arith.subf %18, %21 : vector<32x3xf32>
    %c0_10 = arith.constant 0 : index
    %c0_11 = arith.constant 0 : index
    %23 = vector.load %arg6[%c0_10, %c0_11] : memref<32x3xf32, #tpu.memory_space<vmem>>, vector<32x3xf32>
    tpu.vector_store %arg6[%c0_10, %c0_11], %22 {strides = array<i32>} : memref<32x3xf32, #tpu.memory_space<vmem>>, vector<32x3xf32>,
    %cst_12 = arith.constant 2.000000e+00 : f32
    %24 = vector.broadcast %cst_12 : f32 to vector<32x3xf32>
    %25 = arith.mulf %24, %14 : vector<32x3xf32>
    %26 = arith.mulf %25, %18 : vector<32x3xf32>
    %27 = arith.subf %19, %26 : vector<32x3xf32>
    %28 = vector.broadcast %11 : vector<32x1xf32> to vector<32x3xf32>
    %29 = arith.mulf %28, %14 : vector<32x3xf32>
    %30 = arith.mulf %29, %14 : vector<32x3xf32>
    %31 = arith.addf %27, %30 : vector<32x3xf32>
    %cst_13 = arith.constant 5.000000e-01 : f32
    %32 = vector.broadcast %cst_13 : f32 to vector<32x3xf32>
    %33 = arith.mulf %32, %31 : vector<32x3xf32>
    %c0_14 = arith.constant 0 : index
    %c0_15 = arith.constant 0 : index
    %34 = vector.load %arg5[%c0_14, %c0_15] : memref<32x3xf32, #tpu.memory_space<vmem>>, vector<32x3xf32>
    tpu.vector_store %arg5[%c0_14, %c0_15], %33 {strides = array<i32>} : memref<32x3xf32, #tpu.memory_space<vmem>>, vector<32x3xf32>,
    return
  }
  func.func @transform_0(%arg0: i32) -> (i32, i32) {
    %c0_i32 = arith.constant 0 : i32
    %c0_i32_0 = arith.constant 0 : i32
    return %arg0, %c0_i32 : i32, i32
  }
  func.func @transform_1(%arg0: i32) -> (i32, i32) {
    %c0_i32 = arith.constant 0 : i32
    %c0_i32_0 = arith.constant 0 : i32
    return %arg0, %c0_i32 : i32, i32
  }
  func.func @transform_2(%arg0: i32) -> (i32, i32) {
    %c0_i32 = arith.constant 0 : i32
    %c0_i32_0 = arith.constant 0 : i32
    %c0_i32_1 = arith.constant 0 : i32
    return %c0_i32, %c0_i32_0 : i32, i32
  }
  func.func @transform_3(%arg0: i32) -> (i32, i32) {
    %c0_i32 = arith.constant 0 : i32
    %c0_i32_0 = arith.constant 0 : i32
    return %arg0, %c0_i32 : i32, i32
  }
  func.func @transform_4(%arg0: i32) -> (i32, i32) {
    %c0_i32 = arith.constant 0 : i32
    %c0_i32_0 = arith.constant 0 : i32
    return %arg0, %c0_i32 : i32, i32
  }
  func.func @transform_5(%arg0: i32) -> (i32, i32) {
    %c0_i32 = arith.constant 0 : i32
    %c0_i32_0 = arith.constant 0 : i32
    return %arg0, %c0_i32 : i32, i32
  }
}

</mosaic_0001>

<bundles_post_ra>
// kernel: dc_dirgnn_forward.5
= control target key start
LH: loop header
LB: loop body
LE: loop exit
PB: predicated region body
PF: predicated region fallthrough
CT: control target
= control target key end

     0   :  { %vm33_vm0 = vcmask 130048   ;;  %vm267_vm1 = vcmask 31744   ;;  %s530_s1 = inlined_call_operand.vmem [shape: f32[16,128], index: 1, kind: input, shape index: {}]   ;;  %s531_s0 = inlined_call_operand.vmem [shape: f32[32,16], index: 0, kind: input, shape index: {}]   ;;  %s532_s3 = inlined_call_operand.vmem [shape: f32[128,4], index: 3, kind: input, shape index: {}]   ;;  %s533_s2 = inlined_call_operand.vmem [shape: f32[1,128], index: 2, kind: input, shape index: {}]   ;;  %s534_s4 = inlined_call_operand.vmem [shape: f32[1,4], index: 4, kind: input, shape index: {}]   ;;  %s535_s5 = inlined_call_operand.vmem [shape: f32[32,4], index: 5, kind: output, shape index: {}]  }
   0x1   :  { %v24_v0 = vld [vmem:[%s530_s1] sm:$0xff]  ;;  %v25_v1 = vld [vmem:[%s530_s1 + $0x8] sm:$0xff]  ;;  %v137_v6 = vld [vmem:[%s532_s3 + $0x10] sm:$0xff] }
   0x2   :  { %v20_v2 = vld [vmem:[%s531_s0] sm:$0xff]  ;;  %v360_v3 = vpack.c.bf16 %v25_v1, %v24_v0  ;;  %v136_v5 = vld [vmem:[%s532_s3 + $0x8] sm:$0xff]  ;;  %v138_v8 = vld [vmem:[%s532_s3 + $0x18] sm:$0xff] }
   0x3   :  { %316 = vmatprep.mubr.msk.f32.mxu0 %vm33_vm0, %v20_v2  ;;  %v135_v4 = vld [vmem:[%s532_s3] sm:$0xff]  ;;  %v21_v9 = vld [vmem:[%s531_s0 + $0x8] sm:$0xff]  ;;  %v368_v10 = vpack.c.bf16 %v138_v8, %v137_v6  ;;  %v22_v13 = vld [vmem:[%s531_s0 + $0x10] sm:$0xff] }
   0x4   :  { %361 = vmatprep.subr.bf16.mxu0 %v360_v3  ;;  %v364_v7 = vpack.c.bf16 %v136_v5, %v135_v4  ;;  %v139_v11 = vld [vmem:[%s532_s3 + $0x20] sm:$0xff]  ;;  %v140_v12 = vld [vmem:[%s532_s3 + $0x28] sm:$0xff]  ;;  %v23_v15 = vld [vmem:[%s531_s0 + $0x18] sm:$0xff] }
   0x5   :  { %363 = vmatpush3.bf16.msra.mxu0 %v360_v3  ;;  %v372_v14 = vpack.c.bf16 %v140_v12, %v139_v11  ;;  %v141_v16 = vld [vmem:[%s532_s3 + $0x30] sm:$0xff]  ;;  %v142_v17 = vld [vmem:[%s532_s3 + $0x38] sm:$0xff]  ;;  %v143_v19 = vld [vmem:[%s532_s3 + $0x40] sm:$0xff] }
   0x6   :  { %365 = vmatprep.subr.bf16.mxu1 %v364_v7  ;;  %v376_v18 = vpack.c.bf16 %v142_v17, %v141_v16  ;;  %v144_v20 = vld [vmem:[%s532_s3 + $0x48] sm:$0xff]  ;;  %v145_v22 = vld [vmem:[%s532_s3 + $0x50] sm:$0xff]  ;;  %v146_v23 = vld [vmem:[%s532_s3 + $0x58] sm:$0xff] }
   0x7   :  { %367 = vmatpush3.bf16.msra.mxu1 %v364_v7  ;;  %v380_v21 = vpack.c.bf16 %v144_v20, %v143_v19  ;;  %v384_v24 = vpack.c.bf16 %v146_v23, %v145_v22  ;;  %v147_v25 = vld [vmem:[%s532_s3 + $0x60] sm:$0xff]  ;;  %v148_v26 = vld [vmem:[%s532_s3 + $0x68] sm:$0xff]  ;;  %v149_v28 = vld [vmem:[%s532_s3 + $0x70] sm:$0xff] }
   0x8   :  { %317 = vmatmul.mubr.msk.f32.vlgmr.msra.gmra.mrb[0].mxu0 %vm33_vm0, %v21_v9  ;;  %369 = vmatprep.subr.bf16.mxu1 %v368_v10  ;;  %v388_v27 = vpack.c.bf16 %v148_v26, %v147_v25  ;;  %v150_v29 = vld [vmem:[%s532_s3 + $0x78] sm:$0xff]  ;;  %v276_v31 = vld [vmem:[%s533_s2] ss:$0 sm:$0xff] }
   0x9   :  { %319 = vmatprep.mubr.msk.f32.mxu0 %vm33_vm0, %v22_v13  ;;  %v392_v30 = vpack.c.bf16 %v150_v29, %v149_v28  ;;  %v281_v44 = vld [vmem:[%s534_s4] ss:$0 sm:$0xff] }
   0xb   :  { %371 = vmatpush3.bf16.msra.mxu1 %v368_v10 }
   0xc   :  { %320 = vmatmul.mubr.msk.f32.gmra.mrb[2].mxu0 %vm33_vm0, %v23_v15  ;;  %373 = vmatprep.subr.bf16.mxu1 %v372_v14 }
   0xf   :  { %375 = vmatpush3.bf16.msra.mxu1 %v372_v14 }
  0x10   :  { %377 = vmatprep.subr.bf16.mxu1 %v376_v18 }
  0x13   :  { %379 = vmatpush3.bf16.msra.mxu1 %v376_v18 }
  0x14   :  { %381 = vmatprep.subr.bf16.mxu1 %v380_v21 }
  0x17   :  { %383 = vmatpush3.bf16.msra.mxu1 %v380_v21 }
  0x18   :  { %385 = vmatprep.subr.bf16.mxu1 %v384_v24 }
  0x1b   :  { %387 = vmatpush3.bf16.msra.mxu1 %v384_v24 }
  0x1c   :  { %389 = vmatprep.subr.bf16.mxu1 %v388_v27 }
  0x1f   :  { %391 = vmatpush3.bf16.msra.mxu1 %v388_v27 }
  0x20   :  { %393 = vmatprep.subr.bf16.mxu1 %v392_v30 }
  0x23   :  { %395 = vmatpush3.bf16.msra.mxu1 %v392_v30 }
  0xdb   :  { %v318_v32 = vpop.f32.mrb[0].mxu0 }
  0xdc   :  { %v118_v33 = vadd.f32 %v318_v32, %v276_v31  ;;  %v112_v34 = vpop.f32.mrb[1].mxu0 }
  0xdd   :  { %v113_v35 = vadd.f32 %v276_v31, %v112_v34 }
  0xde   :  { %v132_v38 = vmax.f32 %v118_v33, 0.0 }
  0xdf   :  { %v321_v36 = vpop.f32.mrb[2].mxu0  ;;  %v131_v37 = vmax.f32 %v113_v35, 0.0 }
  0xe0   :  { %v128_v39 = vadd.f32 %v321_v36, %v276_v31  ;;  %v122_v40 = vpop.f32.mrb[3].mxu0 }
  0xe1   :  { %v123_v41 = vadd.f32 %v276_v31, %v122_v40  ;;  %354 = vmatprep.mubr.f32.mxu1 %v131_v37 }
  0xe2   :  { %355 = vmatmul.mubr.f32.vlgmr.msra.gmra.mrb[0].mxu1 %v132_v38  ;;  %v134_v43 = vmax.f32 %v128_v39, 0.0 }
  0xe3   :  { %v133_v42 = vmax.f32 %v123_v41, 0.0 }
  0xe5   :  { %357 = vmatprep.mubr.f32.mxu1 %v133_v42 }
  0xe6   :  { %358 = vmatmul.mubr.f32.gmra.mrb[2].mxu1 %v134_v43 }
 0x1b5   :  { %v356_v45 = vpop.f32.mrb[0].mxu1 }
 0x1b6   :  { %v230_v46 = vadd.f32 %v356_v45, %v281_v44  ;;  %v224_v47 = vpop.f32.mrb[1].mxu1 }
 0x1b7   :  { %v225_v48 = vadd.f32 %v281_v44, %v224_v47 }
 0x1b8   :  { %v283_v49 = vmul.f32 -1.442695, %v230_v46 }
 0x1b9   :  { %v282_v50 = vmul.f32 -1.442695, %v225_v48  ;;  %v359_v51 = vpop.f32.mrb[2].mxu1 }
 0x1ba   :  { %396 = vpow2.f32 %v283_v49  ;;  %v240_v52 = vadd.f32 %v359_v51, %v281_v44  ;;  %v234_v53 = vpop.f32.mrb[3].mxu1 }
 0x1bb   :  { %398 = vpow2.f32 %v282_v50  ;;  %v235_v54 = vadd.f32 %v281_v44, %v234_v53 }
 0x1bc   :  { %v285_v55 = vmul.f32 -1.442695, %v240_v52 }
 0x1bd   :  { %v284_v56 = vmul.f32 -1.442695, %v235_v54 }
 0x1be   :  { %400 = vpow2.f32 %v285_v55 }
 0x1bf   :  { %402 = vpow2.f32 %v284_v56 }
 0x1c4   :  { %v397_v57 = vpop.eup %396 }
 0x1c5   :  { %v399_v58 = vpop.eup %398  ;;  %v256_v59 = vadd.f32 1.0, %v397_v57 }
 0x1c6   :  { %v255_v60 = vadd.f32 1.0, %v399_v58 }
 0x1c7   :  { %404 = vrcp.f32 %v256_v59 }
 0x1c8   :  { %v401_v61 = vpop.eup %400  ;;  %406 = vrcp.f32 %v255_v60 }
 0x1c9   :  { %v403_v62 = vpop.eup %402  ;;  %v258_v63 = vadd.f32 1.0, %v401_v61 }
 0x1ca   :  { %v257_v0 = vadd.f32 1.0, %v403_v62 }
 0x1cb   :  { %408 = vrcp.f32 %v258_v63 }
 0x1cc   :  { %410 = vrcp.f32 %v257_v0 }
 0x1d1   :  { %v405_v1 = vpop.eup %404 }
 0x1d2   :  { %v407_v2 = vpop.eup %406  ;;  %269 = vst.msk [vmem:[%s535_s5 + $0x8] sm:$0xff] %vm267_vm1, %v405_v1 }
 0x1d3   :  { %268 = vst.msk [vmem:[%s535_s5] sm:$0xff] %vm267_vm1, %v407_v2 }
 0x1d5   :  { %v409_v3 = vpop.eup %408 }
 0x1d6   :  { %v411_v4 = vpop.eup %410  ;;  %271 = vst.msk [vmem:[%s535_s5 + $0x18] sm:$0xff] %vm267_vm1, %v409_v3 }
 0x1d7   :  { %270 = vst.msk [vmem:[%s535_s5 + $0x10] sm:$0xff] %vm267_vm1, %v411_v4 }

// kernel: dc_dirgnn_forward.8
= control target key start
LH: loop header
LB: loop body
LE: loop exit
PB: predicated region body
PF: predicated region fallthrough
CT: control target
= control target key end

     0   :  { %vm42_vm0 = vcmask 130048   ;;  %v616_v3 = vmov 0   ;;  %vm196_vm1 = vcmask 261120   ;;  %s617_s23 = smov 96   ;;  %s618_s26 = smov 64   ;;  %s779_s4 = inlined_call_operand.vmem [shape: f32[16,96], index: 4, kind: input, shape index: {}]   ;;  %s780_s0 = inlined_call_operand.vmem [shape: f32[32,16], index: 0, kind: input, shape index: {}]   ;;  %s781_s3 = inlined_call_operand.vmem [shape: f32[32,1], index: 3, kind: input, shape index: {}]   ;;  %s782_s2 = inlined_call_operand.vmem [shape: f32[32,1], index: 2, kind: input, shape index: {}]   ;;  %s783_s1 = inlined_call_operand.vmem [shape: f32[32,32], index: 1, kind: input, shape index: {}]   ;;  %s784_s5 = inlined_call_operand.vmem [shape: f32[1,96], index: 5, kind: input, shape index: {}]   ;;  %s785_s6 = inlined_call_operand.vmem [shape: f32[32,32], index: 6, kind: output, shape index: {}]  }
   0x1   :  { %v40_v0 = vld [vmem:[%s779_s4] sm:$0xff]  ;;  %v41_v1 = vld [vmem:[%s779_s4 + $0x8] sm:$0xff]  ;;  %604 = vset.pattern.permute.xlu0 %v616_v3  ;;  %605 = vset.pattern.permute.xlu1 %v616_v3  ;;  %v37_v6 = vld [vmem:[%s781_s3 + $0x10] sm:$0xff] }
   0x2   :  { %v23_v2 = vld [vmem:[%s780_s0] sm:$0xff]  ;;  %v580_v4 = vpack.c.bf16 %v41_v1, %v40_v0  ;;  %v24_v7 = vld [vmem:[%s780_s0 + $0x8] sm:$0xff]  ;;  %320 = vperm.xlu1 %605, %v37_v6   ;;  %v25_v9 = vld [vmem:[%s780_s0 + $0x10] sm:$0xff] }
   0x3   :  { %546 = vmatprep.mubr.msk.f32.mxu0 %vm42_vm0, %v23_v2  ;;  %v35_v5 = vld [vmem:[%s781_s3] sm:$0xff]  ;;  %v36_v8 = vld [vmem:[%s781_s3 + $0x8] sm:$0xff]  ;;  %v38_v10 = vld [vmem:[%s781_s3 + $0x18] sm:$0xff] }
   0x4   :  { %581 = vmatprep.subr.bf16.mxu0 %v580_v4  ;;  %310 = vperm.xlu0 %604, %v35_v5   ;;  %v26_v11 = vld [vmem:[%s780_s0 + $0x18] sm:$0xff]  ;;  %v31_v12 = vld [vmem:[%s782_s2] sm:$0xff]  ;;  %v32_v13 = vld [vmem:[%s782_s2 + $0x8] sm:$0xff] }
   0x5   :  { %583 = vmatpush3.bf16.msra.mxu0 %v580_v4  ;;  %v33_v14 = vld [vmem:[%s782_s2 + $0x10] sm:$0xff]  ;;  %v34_v15 = vld [vmem:[%s782_s2 + $0x18] sm:$0xff]  ;;  %v27_v29 = vld [vmem:[%s783_s1] sm:$0xff] }
   0x6   :  { %325 = vperm.xlu1 %605, %v38_v10   ;;  %v731_v41 = vld [vmem:[%s784_s5] ss:$0 sm:$0xff]  ;;  %v28_v42 = vld [vmem:[%s783_s1 + $0x8] sm:$0xff]  ;;  %v29_v43 = vld [vmem:[%s783_s1 + $0x10] sm:$0xff] }
   0x7   :  { %v30_v44 = vld [vmem:[%s783_s1 + $0x18] sm:$0xff] }
   0x8   :  { %547 = vmatmul.mubr.msk.f32.vlgmr.msra.gmra.mrb[0].mxu0 %vm42_vm0, %v24_v7  ;;  %315 = vperm.xlu0 %604, %v36_v8  }
   0x9   :  { %549 = vmatprep.mubr.msk.f32.mxu0 %vm42_vm0, %v25_v9 }
   0xa   :  { %147 = vperm.xlu1 %605, %v32_v13  }
   0xc   :  { %550 = vmatmul.mubr.msk.f32.gmra.mrb[2].mxu0 %vm42_vm0, %v26_v11  ;;  %142 = vperm.xlu0 %604, %v31_v12  }
   0xd   :  { %574 = vmatprep.mubr.msk.f32.mxu0 %vm196_vm1, %v27_v29 }
   0xe   :  { %157 = vperm.xlu1 %605, %v34_v15  }
  0x10   :  { %152 = vperm.xlu0 %604, %v33_v14  }
  0x81   :  { %v700_v16 = vpop.permute.xlu1 %320 }
  0x83   :  { %v702_v17 = vpop.permute.xlu0 %310 }
  0x85   :  { %v704_v18 = vpop.permute.xlu1 %325 }
  0x87   :  { %v706_v19 = vpop.permute.xlu0 %315 }
  0x89   :  { %v708_v20 = vpop.permute.xlu1 %147 }
  0x8b   :  { %v710_v21 = vpop.permute.xlu0 %142 }
  0x8d   :  { %v715_v27 = vpop.permute.xlu1 %157 }
  0x8f   :  { %v722_v33 = vpop.permute.xlu0 %152 }
  0xdb   :  { %v548_v22 = vpop.f32.mrb[0].mxu0 }
  0xdc   :  { %v329_v23 = vmul.f32 %v548_v22, %v706_v19  ;;  %v121_v24 = vpop.f32.mrb[1].mxu0  ;;  %v161_v25 = vmul.f32 %v548_v22, %v708_v20 }
  0xdd   :  { %v328_v26 = vmul.f32 %v702_v17, %v121_v24  ;;  %v160_v28 = vmul.f32 %v710_v21, %v121_v24 }
  0xdf   :  { %v551_v30 = vpop.f32.mrb[2].mxu0  ;;  %v606_v31 = vpack.i.bf16 %v329_v23, %v328_v26  ;;  %v584_v32 = vpack.c.bf16 %v161_v25, %v160_v28 }
  0xe0   :  { %v331_v34 = vmul.f32 %v551_v30, %v704_v18  ;;  %v163_v35 = vmul.f32 %v551_v30, %v715_v27  ;;  %v131_v36 = vpop.f32.mrb[3].mxu0 }
  0xe1   :  { %v162_v37 = vmul.f32 %v722_v33, %v131_v36  ;;  %v330_v38 = vmul.f32 %v700_v16, %v131_v36  ;;  %607 = vrot.lane.b32.xlu0 %v606_v31, %s617_s23  ;;  %585 = vmatprep.subr.bf16.mxu1 %v584_v32 }
  0xe2   :  { %587 = vmatpush3.bf16.msra.mxu1 %v584_v32 }
  0xe3   :  { %v611_v39 = vpack.i.bf16 %v331_v34, %v330_v38  ;;  %v588_v40 = vpack.c.bf16 %v163_v35, %v162_v37 }
  0xe5   :  { %612 = vrot.lane.b32.xlu1 %v611_v39, %s617_s23  ;;  %589 = vmatprep.subr.bf16.mxu1 %v588_v40 }
  0xe6   :  { %591 = vmatpush3.bf16.msra.mxu1 %v588_v40 }
  0xe9   :  { %449 = vrot.lane.b32.xlu1 %v731_v41, %s617_s23 }
  0xed   :  { %472 = vrot.lane.b32.xlu1 %v121_v24, %s618_s26 }
  0xf1   :  { %474 = vrot.lane.b32.xlu1 %v548_v22, %s618_s26 }
  0xf5   :  { %476 = vrot.lane.b32.xlu1 %v131_v36, %s618_s26 }
  0xf9   :  { %478 = vrot.lane.b32.xlu1 %v551_v30, %s618_s26 }
  0xfd   :  { %488 = vrot.lane.b32.xlu1 %v731_v41, %s618_s26 }
  0xff   :  { %164 = vxpose.xlu0.b32.start [1/4] (short) (narrow) %v27_v29, 32 }
 0x103   :  { %165 = vxpose.xlu0.b32.cont [2/4] (short) (narrow) %v28_v42, 32 }
 0x107   :  { %166 = vxpose.xlu0.b32.cont [3/4] (short) (narrow) %v29_v43, 32 }
 0x10b   :  { %167 = vxpose.xlu0.b32.end [4/4] (short) (narrow) %v30_v44, 32 }
 0x153   :  { %v608_v45 = vpop.permute.xlu0 %607 }
 0x154   :  { %v610_v46 = vunpack.i.h.bf16 %v608_v45  ;;  %v609_v47 = vunpack.i.l.bf16 %v608_v45 }
 0x156   :  { %v592_v48 = vpack.c.bf16 %v610_v46, %v609_v47 }
 0x157   :  { %v613_v49 = vpop.permute.xlu1 %612 }
 0x158   :  { %v615_v50 = vunpack.i.h.bf16 %v613_v49  ;;  %v614_v51 = vunpack.i.l.bf16 %v613_v49  ;;  %593 = vmatprep.subr.bf16.mxu0 %v592_v48 }
 0x159   :  { %595 = vmatpush3.bf16.msra.mxu0 %v592_v48 }
 0x15a   :  { %v596_v52 = vpack.c.bf16 %v615_v50, %v614_v51 }
 0x15b   :  { %v450_v61 = vpop.permute.xlu1 %449 }
 0x15c   :  { %597 = vmatprep.subr.bf16.mxu0 %v596_v52 }
 0x15d   :  { %599 = vmatpush3.bf16.msra.mxu0 %v596_v52 }
 0x15f   :  { %v473_v62 = vpop.permute.xlu1 %472 }
 0x160   :  { %575 = vmatmul.mubr.msk.f32.vlgmr.msra.gmra.mrb[4].mxu0 %vm196_vm1, %v28_v42 }
 0x161   :  { %577 = vmatprep.mubr.msk.f32.mxu0 %vm196_vm1, %v29_v43 }
 0x163   :  { %v475_v63 = vpop.permute.xlu1 %474 }
 0x164   :  { %578 = vmatmul.mubr.msk.f32.gmra.mrb[6].mxu0 %vm196_vm1, %v30_v44 }
 0x167   :  { %v477_v1 = vpop.permute.xlu1 %476 }
 0x16b   :  { %v479_v10 = vpop.permute.xlu1 %478 }
 0x16f   :  { %v489_v24 = vpop.permute.xlu1 %488 }
 0x17f   :  { %v180_v53 = vpop.trf.xlu0 }
 0x180   :  { %560 = vmatprep.mubr.msk.f32.mxu1 %vm196_vm1, %v180_v53 }
 0x183   :  { %v181_v54 = vpop.trf.xlu0 }
 0x184   :  { %561 = vmatmul.mubr.msk.f32.vlgmr.msra.gmra.mrb[0].mxu1 %vm196_vm1, %v181_v54 }
 0x187   :  { %v182_v55 = vpop.trf.xlu0 }
 0x188   :  { %563 = vmatprep.mubr.msk.f32.mxu1 %vm196_vm1, %v182_v55 }
 0x18b   :  { %v183_v56 = vpop.trf.xlu0 }
 0x18c   :  { %564 = vmatmul.mubr.msk.f32.gmra.mrb[2].mxu1 %vm196_vm1, %v183_v56 }
 0x233   :  { %v576_v57 = vpop.f32.mrb[4].mxu0 }
 0x234   :  { %v426_v58 = vpop.f32.mrb[5].mxu0  ;;  %v446_v0 = vmul.f32 %v576_v57, %v706_v19 }
 0x235   :  { %v445_v2 = vmul.f32 %v426_v58, %v702_v17 }
 0x236   :  { %v453_v4 = vadd.f32 %v450_v61, %v446_v0 }
 0x237   :  { %v579_v59 = vpop.f32.mrb[6].mxu0  ;;  %v452_v7 = vadd.f32 %v450_v61, %v445_v2 }
 0x238   :  { %v436_v60 = vpop.f32.mrb[7].mxu0  ;;  %v457_v12 = vmul.f32 0.5, %v453_v4  ;;  %v448_v13 = vmul.f32 %v579_v59, %v704_v18 }
 0x239   :  { %v456_v15 = vmul.f32 0.5, %v452_v7  ;;  %v447_v17 = vmul.f32 %v436_v60, %v700_v16 }
 0x23a   :  { %v455_v25 = vadd.f32 %v450_v61, %v448_v13 }
 0x23b   :  { %v454_v29 = vadd.f32 %v450_v61, %v447_v17 }
 0x23c   :  { %v459_v35 = vmul.f32 0.5, %v455_v25 }
 0x23d   :  { %v458_v38 = vmul.f32 0.5, %v454_v29 }
 0x257   :  { %v562_v3 = vpop.f32.mrb[0].mxu1 }
 0x258   :  { %v295_v5 = vmul.f32 %v562_v3, %v708_v20  ;;  %v275_v6 = vpop.f32.mrb[1].mxu1 }
 0x259   :  { %v294_v8 = vmul.f32 %v275_v6, %v710_v21 }
 0x25a   :  { %v305_v9 = vadd.f32 %v731_v41, %v295_v5 }
 0x25b   :  { %v304_v11 = vadd.f32 %v731_v41, %v294_v8 }
 0x25c   :  { %v461_v14 = vmul.f32 0.5, %v305_v9 }
 0x25d   :  { %v460_v19 = vmul.f32 0.5, %v304_v11 }
 0x25e   :  { %v465_v22 = vadd.f32 %v461_v14, %v457_v12 }
 0x25f   :  { %v464_v23 = vadd.f32 %v460_v19, %v456_v15  ;;  %v565_v20 = vpop.f32.mrb[2].mxu1 }
 0x260   :  { %v297_v21 = vmul.f32 %v565_v20, %v715_v27  ;;  %v285_v26 = vpop.f32.mrb[3].mxu1  ;;  %v485_v28 = vadd.f32 %v475_v63, %v465_v22 }
 0x261   :  { %v296_v30 = vmul.f32 %v285_v26, %v722_v33  ;;  %v484_v31 = vadd.f32 %v473_v62, %v464_v23 }
 0x262   :  { %v307_v18 = vadd.f32 %v731_v41, %v297_v21  ;;  %v492_v32 = vadd.f32 %v489_v24, %v485_v28 }
 0x263   :  { %v306_v34 = vadd.f32 %v731_v41, %v296_v30  ;;  %v491_v16 = vadd.f32 %v489_v24, %v484_v31 }
 0x264   :  { %v463_v36 = vmul.f32 0.5, %v307_v18  ;;  %v496_v37 = vmax.f32 %v492_v32, 0.0 }
 0x265   :  { %v462_v39 = vmul.f32 0.5, %v306_v34  ;;  %v495_v40 = vmax.f32 %v491_v16, 0.0 }
 0x266   :  { %v467_v42 = vadd.f32 %v463_v36, %v459_v35  ;;  %500 = vst.msk [vmem:[%s785_s6 + $0x8] sm:$0xff] %vm196_vm1, %v496_v37 }
 0x267   :  { %v466_v27 = vadd.f32 %v462_v39, %v458_v38  ;;  %499 = vst.msk [vmem:[%s785_s6] sm:$0xff] %vm196_vm1, %v495_v40 }
 0x268   :  { %v487_v33 = vadd.f32 %v479_v10, %v467_v42 }
 0x269   :  { %v486_v41 = vadd.f32 %v477_v1, %v466_v27 }
 0x26a   :  { %v494_v43 = vadd.f32 %v489_v24, %v487_v33 }
 0x26b   :  { %v493_v44 = vadd.f32 %v489_v24, %v486_v41 }
 0x26c   :  { %v498_v45 = vmax.f32 %v494_v43, 0.0 }
 0x26d   :  { %v497_v46 = vmax.f32 %v493_v44, 0.0 }
 0x26e   :  { %502 = vst.msk [vmem:[%s785_s6 + $0x18] sm:$0xff] %vm196_vm1, %v498_v45 }
 0x26f   :  { %501 = vst.msk [vmem:[%s785_s6 + $0x10] sm:$0xff] %vm196_vm1, %v497_v46 }

// kernel: dc_dirgnn_forward.9
= control target key start
LH: loop header
LB: loop body
LE: loop exit
PB: predicated region body
PF: predicated region fallthrough
CT: control target
= control target key end

     0   :  { %vm44_vm0 = vcmask 261120   ;;  %v696_v3 = vmov 0   ;;  %s698_s30 = smov 112   ;;  %vm500_vm1 = vcmask 64512   ;;  %s873_s4 = inlined_call_operand.vmem [shape: f32[32,24], index: 4, kind: input, shape index: {}]   ;;  %s874_s0 = inlined_call_operand.vmem [shape: f32[32,32], index: 0, kind: input, shape index: {}]   ;;  %s875_s3 = inlined_call_operand.vmem [shape: f32[32,1], index: 3, kind: input, shape index: {}]   ;;  %s876_s2 = inlined_call_operand.vmem [shape: f32[32,1], index: 2, kind: input, shape index: {}]   ;;  %s877_s1 = inlined_call_operand.vmem [shape: f32[32,32], index: 1, kind: input, shape index: {}]   ;;  %s878_s5 = inlined_call_operand.vmem [shape: f32[1,24], index: 5, kind: input, shape index: {}]   ;;  %s879_s6 = inlined_call_operand.vmem [shape: f32[32,8], index: 6, kind: output, shape index: {}]  }
   0x1   :  { %v40_v0 = vld [vmem:[%s873_s4] sm:$0xff]  ;;  %v41_v1 = vld [vmem:[%s873_s4 + $0x8] sm:$0xff]  ;;  %v42_v2 = vld [vmem:[%s873_s4 + $0x10] sm:$0xff]  ;;  %668 = vset.pattern.permute.xlu0 %v696_v3  ;;  %669 = vset.pattern.permute.xlu1 %v696_v3 }
   0x2   :  { %v636_v4 = vpack.c.bf16 %v41_v1, %v40_v0  ;;  %v43_v5 = vld [vmem:[%s873_s4 + $0x18] sm:$0xff]  ;;  %v23_v6 = vld [vmem:[%s874_s0] sm:$0xff]  ;;  %v37_v9 = vld [vmem:[%s875_s3 + $0x10] sm:$0xff] }
   0x3   :  { %v640_v7 = vpack.c.bf16 %v43_v5, %v42_v2  ;;  %602 = vmatprep.mubr.msk.f32.mxu0 %vm44_vm0, %v23_v6  ;;  %v35_v8 = vld [vmem:[%s875_s3] sm:$0xff]  ;;  %v36_v10 = vld [vmem:[%s875_s3 + $0x8] sm:$0xff]  ;;  %321 = vperm.xlu1 %669, %v37_v9   ;;  %v38_v11 = vld [vmem:[%s875_s3 + $0x18] sm:$0xff] }
   0x4   :  { %637 = vmatprep.subr.bf16.mxu0 %v636_v4  ;;  %311 = vperm.xlu0 %668, %v35_v8   ;;  %v24_v12 = vld [vmem:[%s874_s0 + $0x8] sm:$0xff]  ;;  %v31_v13 = vld [vmem:[%s876_s2] sm:$0xff]  ;;  %v25_v14 = vld [vmem:[%s874_s0 + $0x10] sm:$0xff] }
   0x5   :  { %639 = vmatpush3.bf16.msra.mxu0 %v636_v4  ;;  %v32_v15 = vld [vmem:[%s876_s2 + $0x8] sm:$0xff]  ;;  %v26_v16 = vld [vmem:[%s874_s0 + $0x18] sm:$0xff]  ;;  %v33_v17 = vld [vmem:[%s876_s2 + $0x10] sm:$0xff]  ;;  %s697_s0 = smov 120  }
   0x6   :  { %641 = vmatprep.subr.bf16.mxu0 %v640_v7  ;;  %v34_v18 = vld [vmem:[%s876_s2 + $0x18] sm:$0xff]  ;;  %v27_v19 = vld [vmem:[%s877_s1] sm:$0xff]  ;;  %v28_v45 = vld [vmem:[%s877_s1 + $0x8] sm:$0xff] }
   0x7   :  { %326 = vperm.xlu1 %669, %v38_v11   ;;  %v817_v44 = vld [vmem:[%s878_s5] ss:$0 sm:$0xff]  ;;  %v29_v46 = vld [vmem:[%s877_s1 + $0x10] sm:$0xff]  ;;  %v30_v47 = vld [vmem:[%s877_s1 + $0x18] sm:$0xff] }
   0x8   :  { %316 = vperm.xlu0 %668, %v36_v10  }
   0x9   :  { %643 = vmatpush3.bf16.msra.mxu0 %v640_v7 }
   0xb   :  { %149 = vperm.xlu1 %669, %v32_v15  }
   0xc   :  { %603 = vmatmul.mubr.msk.f32.vlgmr.msra.gmra.mrb[0].mxu0 %vm44_vm0, %v24_v12  ;;  %144 = vperm.xlu0 %668, %v31_v13  }
   0xd   :  { %605 = vmatprep.mubr.msk.f32.mxu0 %vm44_vm0, %v25_v14 }
   0xf   :  { %159 = vperm.xlu1 %669, %v34_v18  }
  0x10   :  { %606 = vmatmul.mubr.msk.f32.gmra.mrb[2].mxu0 %vm44_vm0, %v26_v16  ;;  %154 = vperm.xlu0 %668, %v33_v17  }
  0x11   :  { %630 = vmatprep.mubr.msk.f32.mxu0 %vm44_vm0, %v27_v19 }
  0x82   :  { %v790_v20 = vpop.permute.xlu1 %321 }
  0x83   :  { %v792_v21 = vpop.permute.xlu0 %311 }
  0x86   :  { %v794_v22 = vpop.permute.xlu1 %326 }
  0x87   :  { %v796_v23 = vpop.permute.xlu0 %316 }
  0x8a   :  { %v798_v24 = vpop.permute.xlu1 %149 }
  0x8b   :  { %v800_v25 = vpop.permute.xlu0 %144 }
  0x8e   :  { %v805_v31 = vpop.permute.xlu1 %159 }
  0x8f   :  { %v808_v36 = vpop.permute.xlu0 %154 }
  0xdf   :  { %v604_v26 = vpop.f32.mrb[0].mxu0 }
  0xe0   :  { %v330_v27 = vmul.f32 %v604_v26, %v796_v23  ;;  %v123_v28 = vpop.f32.mrb[1].mxu0  ;;  %v163_v29 = vmul.f32 %v604_v26, %v798_v24 }
  0xe1   :  { %v329_v30 = vmul.f32 %v792_v21, %v123_v28  ;;  %v162_v32 = vmul.f32 %v800_v25, %v123_v28 }
  0xe3   :  { %v607_v33 = vpop.f32.mrb[2].mxu0  ;;  %v670_v34 = vpack.i.bf16 %v330_v27, %v329_v30  ;;  %v644_v35 = vpack.c.bf16 %v163_v29, %v162_v32 }
  0xe4   :  { %v332_v37 = vmul.f32 %v607_v33, %v794_v22  ;;  %v165_v38 = vmul.f32 %v607_v33, %v805_v31  ;;  %v133_v39 = vpop.f32.mrb[3].mxu0 }
  0xe5   :  { %v164_v40 = vmul.f32 %v808_v36, %v133_v39  ;;  %v331_v41 = vmul.f32 %v790_v20, %v133_v39  ;;  %671 = vrot.lane.b32.xlu0 %v670_v34, %s697_s0  ;;  %645 = vmatprep.subr.bf16.mxu1 %v644_v35 }
  0xe6   :  { %647 = vmatpush3.bf16.msra.mxu1 %v644_v35 }
  0xe7   :  { %v675_v42 = vpack.i.bf16 %v332_v37, %v331_v41  ;;  %v648_v43 = vpack.c.bf16 %v165_v38, %v164_v40 }
  0xe9   :  { %676 = vrot.lane.b32.xlu1 %v675_v42, %s697_s0  ;;  %649 = vmatprep.subr.bf16.mxu1 %v648_v43 }
  0xea   :  { %651 = vmatpush3.bf16.msra.mxu1 %v648_v43 }
  0xed   :  { %450 = vrot.lane.b32.xlu1 %v817_v44, %s697_s0 }
  0xf1   :  { %473 = vrot.lane.b32.xlu1 %v123_v28, %s698_s30 }
  0xf5   :  { %475 = vrot.lane.b32.xlu1 %v604_v26, %s698_s30 }
  0xf9   :  { %477 = vrot.lane.b32.xlu1 %v133_v39, %s698_s30 }
  0xfd   :  { %479 = vrot.lane.b32.xlu1 %v607_v33, %s698_s30 }
 0x101   :  { %489 = vrot.lane.b32.xlu1 %v817_v44, %s698_s30 }
 0x103   :  { %166 = vxpose.xlu0.b32.start [1/4] (short) (narrow) %v27_v19, 32 }
 0x107   :  { %167 = vxpose.xlu0.b32.cont [2/4] (short) (narrow) %v28_v45, 32 }
 0x10b   :  { %168 = vxpose.xlu0.b32.cont [3/4] (short) (narrow) %v29_v46, 32 }
 0x10f   :  { %169 = vxpose.xlu0.b32.end [4/4] (short) (narrow) %v30_v47, 32 }
 0x157   :  { %v672_v48 = vpop.permute.xlu0 %671 }
 0x158   :  { %v674_v49 = vunpack.i.h.bf16 %v672_v48  ;;  %v673_v50 = vunpack.i.l.bf16 %v672_v48 }
 0x15a   :  { %v652_v51 = vpack.c.bf16 %v674_v49, %v673_v50 }
 0x15b   :  { %v677_v52 = vpop.permute.xlu1 %676 }
 0x15c   :  { %v679_v53 = vunpack.i.h.bf16 %v677_v52  ;;  %v678_v54 = vunpack.i.l.bf16 %v677_v52  ;;  %653 = vmatprep.subr.bf16.mxu0 %v652_v51  ;;  %660 = vmatprep.subr.bf16.mxu1 %v652_v51 }
 0x15d   :  { %655 = vmatpush3.bf16.msra.mxu0 %v652_v51 }
 0x15e   :  { %v656_v55 = vpack.c.bf16 %v679_v53, %v678_v54 }
 0x15f   :  { %v451_v62 = vpop.permute.xlu1 %450 }
 0x160   :  { %657 = vmatprep.subr.bf16.mxu0 %v656_v55 }
 0x161   :  { %659 = vmatpush3.bf16.msra.mxu0 %v656_v55 }
 0x163   :  { %v474_v63 = vpop.permute.xlu1 %473 }
 0x164   :  { %631 = vmatmul.mubr.msk.f32.vlgmr.msra.gmra.mrb[4].mxu0 %vm44_vm0, %v28_v45 }
 0x167   :  { %v476_v0 = vpop.permute.xlu1 %475 }
 0x16b   :  { %v478_v2 = vpop.permute.xlu1 %477 }
 0x16f   :  { %v480_v11 = vpop.permute.xlu1 %479 }
 0x183   :  { %v182_v56 = vpop.trf.xlu0 }
 0x184   :  { %616 = vmatprep.mubr.msk.f32.mxu1 %vm44_vm0, %v182_v56 }
 0x187   :  { %v183_v57 = vpop.trf.xlu0 }
 0x188   :  { %617 = vmatmul.mubr.msk.f32.vlgmr.msra.gmra.mrb[0].mxu1 %vm44_vm0, %v183_v57 }
 0x189   :  { %662 = vmatpush3.bf16.msra.mxu1 %v652_v51 }
 0x18a   :  { %661 = vmatprep.subr.bf16.mxu1 %v656_v55 }
 0x18b   :  { %v184_v58 = vpop.trf.xlu0 }
 0x18c   :  { %619 = vmatprep.mubr.msk.f32.mxu1 %vm44_vm0, %v184_v58 }
 0x18d   :  { %663 = vmatpush3.bf16.msra.mxu1 %v656_v55 }
 0x18f   :  { %v185_v59 = vpop.trf.xlu0 }
 0x190   :  { %620 = vmatmul.mubr.msk.f32.gmra.mrb[2].mxu1 %vm44_vm0, %v185_v59 }
 0x191   :  { %633 = vmatprep.mubr.msk.f32.mxu1 %vm44_vm0, %v29_v46 }
 0x194   :  { %634 = vmatmul.mubr.msk.f32.vlgmr.msra.gmra.mrb[4].mxu1 %vm44_vm0, %v30_v47 }
 0x237   :  { %v632_v60 = vpop.f32.mrb[4].mxu0 }
 0x238   :  { %v427_v61 = vpop.f32.mrb[5].mxu0  ;;  %v447_v1 = vmul.f32 %v632_v60, %v796_v23 }
 0x239   :  { %v446_v3 = vmul.f32 %v427_v61, %v792_v21  ;;  %v490_v21 = vpop.permute.xlu1 %489 }
 0x23a   :  { %v454_v5 = vadd.f32 %v451_v62, %v447_v1 }
 0x23b   :  { %v453_v8 = vadd.f32 %v451_v62, %v446_v3 }
 0x23c   :  { %v458_v13 = vmul.f32 0.5, %v454_v5 }
 0x23d   :  { %v457_v15 = vmul.f32 0.5, %v453_v8 }
 0x25b   :  { %v618_v4 = vpop.f32.mrb[0].mxu1 }
 0x25c   :  { %v296_v6 = vmul.f32 %v618_v4, %v798_v24  ;;  %v276_v7 = vpop.f32.mrb[1].mxu1 }
 0x25d   :  { %v295_v9 = vmul.f32 %v276_v7, %v800_v25 }
 0x25e   :  { %v306_v10 = vadd.f32 %v817_v44, %v296_v6 }
 0x25f   :  { %v305_v12 = vadd.f32 %v817_v44, %v295_v9 }
 0x260   :  { %v462_v14 = vmul.f32 0.5, %v306_v10 }
 0x261   :  { %v461_v16 = vmul.f32 0.5, %v305_v12 }
 0x262   :  { %v466_v17 = vadd.f32 %v462_v14, %v458_v13 }
 0x263   :  { %v465_v18 = vadd.f32 %v461_v16, %v457_v15  ;;  %v621_v19 = vpop.f32.mrb[2].mxu1 }
 0x264   :  { %v298_v23 = vmul.f32 %v621_v19, %v805_v31  ;;  %v286_v24 = vpop.f32.mrb[3].mxu1  ;;  %v486_v26 = vadd.f32 %v476_v0, %v466_v17 }
 0x265   :  { %v297_v27 = vmul.f32 %v286_v24, %v808_v36  ;;  %v485_v25 = vadd.f32 %v474_v63, %v465_v18 }
 0x266   :  { %v493_v28 = vadd.f32 %v490_v21, %v486_v26  ;;  %v308_v32 = vadd.f32 %v817_v44, %v298_v23 }
 0x267   :  { %v635_v29 = vpop.f32.mrb[4].mxu1  ;;  %v492_v30 = vadd.f32 %v490_v21, %v485_v25  ;;  %v307_v37 = vadd.f32 %v817_v44, %v297_v27 }
 0x268   :  { %v449_v33 = vmul.f32 %v635_v29, %v794_v22  ;;  %v437_v34 = vpop.f32.mrb[5].mxu1  ;;  %v497_v35 = vmax.f32 %v493_v28, 0.0  ;;  %v464_v42 = vmul.f32 0.5, %v308_v32 }
 0x269   :  { %v448_v38 = vmul.f32 %v437_v34, %v790_v20  ;;  %v496_v31 = vmax.f32 %v492_v30, 0.0  ;;  %v463_v45 = vmul.f32 0.5, %v307_v37 }
 0x26a   :  { %v456_v39 = vadd.f32 %v451_v62, %v449_v33  ;;  %v504_v40 = vsel %vm500_vm1, %v497_v35, -inf }
 0x26b   :  { %v455_v36 = vadd.f32 %v451_v62, %v448_v38  ;;  %505 = vmax.xlane.f32.xlu0 %v504_v40  ;;  %v501_v41 = vsel %vm500_vm1, %v496_v31, -inf }
 0x26c   :  { %v460_v43 = vmul.f32 0.5, %v456_v39  ;;  %502 = vmax.xlane.f32.xlu1 %v501_v41 }
 0x26d   :  { %v459_v46 = vmul.f32 0.5, %v455_v36 }
 0x26e   :  { %v468_v22 = vadd.f32 %v464_v42, %v460_v43 }
 0x26f   :  { %v467_v47 = vadd.f32 %v463_v45, %v459_v46 }
 0x270   :  { %v488_v48 = vadd.f32 %v480_v11, %v468_v22 }
 0x271   :  { %v487_v49 = vadd.f32 %v478_v2, %v467_v47 }
 0x272   :  { %v495_v50 = vadd.f32 %v490_v21, %v488_v48 }
 0x273   :  { %v494_v44 = vadd.f32 %v490_v21, %v487_v49 }
 0x274   :  { %v499_v52 = vmax.f32 %v495_v50, 0.0 }
 0x275   :  { %v498_v20 = vmax.f32 %v494_v44, 0.0 }
 0x276   :  { %v510_v53 = vsel %vm500_vm1, %v499_v52, -inf }
 0x277   :  { %v507_v51 = vsel %vm500_vm1, %v498_v20, -inf }
 0x278   :  { %508 = vmax.xlane.f32.xlu1 %v507_v51 }
 0x27c   :  { %511 = vmax.xlane.f32.xlu1 %v510_v53 }
 0x2f8   :  { %v506_v54 = vpop.xlane.xlu0 %505 }
 0x2f9   :  { %v514_v55 = vsub.f32 %v497_v35, %v506_v54  ;;  %v503_v56 = vpop.xlane.xlu1 %502 }
 0x2fa   :  { %v513_v57 = vsub.f32 %v496_v31, %v503_v56 }
 0x2fb   :  { %v519_v58 = vmul.f32 1.442695, %v514_v55 }
 0x2fc   :  { %v517_v59 = vmul.f32 1.442695, %v513_v57 }
 0x2fd   :  { %680 = vpow2.f32 %v519_v58 }
 0x2fe   :  { %682 = vpow2.f32 %v517_v59 }
 0x305   :  { %v509_v60 = vpop.xlane.xlu1 %508 }
 0x306   :  { %v515_v61 = vsub.f32 %v498_v20, %v509_v60 }
 0x307   :  { %v681_v62 = vpop.eup %680 }
 0x308   :  { %v521_v63 = vmul.f32 1.442695, %v515_v61  ;;  %v528_v0 = vsel %vm500_vm1, %v681_v62, 0.0  ;;  %v683_v1 = vpop.eup %682 }
 0x309   :  { %529 = vadd.xlane.f32.xlu1 %v528_v0  ;;  %v512_v2 = vpop.xlane.xlu1 %511  ;;  %v525_v5 = vsel %vm500_vm1, %v683_v1, 0.0 }
 0x30a   :  { %684 = vpow2.f32 %v521_v63  ;;  %v516_v3 = vsub.f32 %v499_v52, %v512_v2 }
 0x30c   :  { %v523_v4 = vmul.f32 1.442695, %v516_v3 }
 0x30d   :  { %526 = vadd.xlane.f32.xlu1 %v525_v5 }
 0x30e   :  { %686 = vpow2.f32 %v523_v4 }
 0x314   :  { %v685_v6 = vpop.eup %684 }
 0x315   :  { %v531_v7 = vsel %vm500_vm1, %v685_v6, 0.0 }
 0x316   :  { %532 = vadd.xlane.f32.xlu1 %v531_v7 }
 0x318   :  { %v687_v8 = vpop.eup %686 }
 0x319   :  { %v534_v9 = vsel %vm500_vm1, %v687_v8, 0.0 }
 0x31a   :  { %535 = vadd.xlane.f32.xlu1 %v534_v9 }
 0x396   :  { %v530_v10 = vpop.xlane.xlu1 %529 }
 0x397   :  { %688 = vlog2.f32 %v530_v10 }
 0x39a   :  { %v527_v11 = vpop.xlane.xlu1 %526 }
 0x39b   :  { %690 = vlog2.f32 %v527_v11 }
 0x3a1   :  { %v689_v12 = vpop.eup %688 }
 0x3a2   :  { %v540_v13 = vmul.f32 0.6931472, %v689_v12 }
 0x3a3   :  { %v533_v14 = vpop.xlane.xlu1 %532 }
 0x3a4   :  { %v546_v15 = vsub.f32 %v514_v55, %v540_v13  ;;  %692 = vlog2.f32 %v533_v14 }
 0x3a5   :  { %v691_v16 = vpop.eup %690 }
 0x3a6   :  { %550 = vst.msk [vmem:[%s879_s6 + $0x8] sm:$0xff] %vm500_vm1, %v546_v15  ;;  %v538_v17 = vmul.f32 0.6931472, %v691_v16 }
 0x3a7   :  { %v536_v18 = vpop.xlane.xlu1 %535 }
 0x3a8   :  { %v545_v19 = vsub.f32 %v513_v57, %v538_v17  ;;  %694 = vlog2.f32 %v536_v18 }
 0x3aa   :  { %549 = vst.msk [vmem:[%s879_s6] sm:$0xff] %vm500_vm1, %v545_v19 }
 0x3ae   :  { %v693_v21 = vpop.eup %692 }
 0x3af   :  { %v542_v23 = vmul.f32 0.6931472, %v693_v21 }
 0x3b1   :  { %v547_v24 = vsub.f32 %v515_v61, %v542_v23 }
 0x3b2   :  { %v695_v26 = vpop.eup %694 }
 0x3b3   :  { %551 = vst.msk [vmem:[%s879_s6 + $0x10] sm:$0xff] %vm500_vm1, %v547_v24  ;;  %v544_v27 = vmul.f32 0.6931472, %v695_v26 }
 0x3b5   :  { %v548_v25 = vsub.f32 %v516_v3, %v544_v27 }
 0x3b7   :  { %552 = vst.msk [vmem:[%s879_s6 + $0x18] sm:$0xff] %vm500_vm1, %v548_v25 }

// kernel: dc_dirgnn_forward.6
= control target key start
LH: loop header
LB: loop body
LE: loop exit
PB: predicated region body
PF: predicated region fallthrough
CT: control target
= control target key end

     0   :  { %s372_s8 = smov 3   ;;  %vm54_vm0 = vcmask 261120   ;;  %vm100_vm1 = vcmask 23552   ;;  %s542_s2 = inlined_call_operand.vmem [shape: f32[32,3], index: 2, kind: input, shape index: {}]   ;;  %s543_s1 = inlined_call_operand.vmem [shape: f32[32,32], index: 1, kind: input, shape index: {}]   ;;  %s544_s0 = inlined_call_operand.vmem [shape: f32[32,32], index: 0, kind: input, shape index: {}]   ;;  %s545_s3 = inlined_call_operand.vmem [shape: f32[32,32], index: 3, kind: output, shape index: {0}]   ;;  %s546_s5 = inlined_call_operand.vmem [shape: f32[32,3], index: 5, kind: output, shape index: {2}]   ;;  %s547_s4 = inlined_call_operand.vmem [shape: f32[32,3], index: 4, kind: output, shape index: {1}]  }
   0x1   :  { %v407_v0 = vld [vmem:[%s542_s2] sm:$0xff]  ;;  %v412_v1 = vld [vmem:[%s542_s2 + $0x8] sm:$0xff]  ;;  %v417_v2 = vld [vmem:[%s542_s2 + $0x10] sm:$0xff] }
   0x2   :  { %v80_v3 = vmul.f32 %v407_v0, %v407_v0  ;;  %v81_v4 = vmul.f32 %v412_v1, %v412_v1  ;;  %v426_v5 = vld [vmem:[%s542_s2 + $0x18] sm:$0xff]  ;;  %v82_v6 = vmul.f32 %v417_v2, %v417_v2  ;;  %v22_v7 = vld [vmem:[%s543_s1] sm:$0xff]  ;;  %v24_v10 = vld [vmem:[%s543_s1 + $0x10] sm:$0xff] }
   0x3   :  { %v83_v8 = vmul.f32 %v426_v5, %v426_v5  ;;  %v302_v9 = vmul.f32 -1.442695, %v22_v7  ;;  %v304_v12 = vmul.f32 -1.442695, %v24_v10  ;;  %v23_v13 = vld [vmem:[%s543_s1 + $0x8] sm:$0xff]  ;;  %v25_v14 = vld [vmem:[%s543_s1 + $0x18] sm:$0xff] }
   0x4   :  { %v346_v11 = vpack.i.bf16 %v81_v4, %v80_v3  ;;  %v303_v15 = vmul.f32 -1.442695, %v23_v13  ;;  %v305_v16 = vmul.f32 -1.442695, %v25_v14  ;;  %v18_v26 = vld [vmem:[%s544_s0] sm:$0xff]  ;;  %v20_v27 = vld [vmem:[%s544_s0 + $0x10] sm:$0xff] }
   0x5   :  { %356 = vpow2.f32 %v302_v9  ;;  %v351_v17 = vpack.i.bf16 %v83_v8, %v82_v6  ;;  %v19_v29 = vld [vmem:[%s544_s0 + $0x8] sm:$0xff]  ;;  %v21_v32 = vld [vmem:[%s544_s0 + $0x18] sm:$0xff]  ;;  %v215_v3 = vmul.f32 2.0, %v412_v1  ;;  %v217_v6 = vmul.f32 2.0, %v426_v5 }
   0x6   :  { %347 = vrot.lane.b32.xlu0 %v346_v11, %s372_s8  ;;  %358 = vpow2.f32 %v304_v12 }
   0x7   :  { %360 = vpow2.f32 %v303_v15 }
   0x8   :  { %362 = vpow2.f32 %v305_v16  ;;  %v214_v16 = vmul.f32 2.0, %v407_v0 }
   0xa   :  { %352 = vrot.lane.b32.xlu0 %v351_v17, %s372_s8 }
   0xf   :  { %v357_v18 = vpop.eup %356 }
  0x10   :  { %v359_v19 = vpop.eup %358  ;;  %v38_v20 = vadd.f32 1.0, %v357_v18  ;;  %v216_v18 = vmul.f32 2.0, %v417_v2 }
  0x11   :  { %v361_v21 = vpop.eup %360  ;;  %v40_v22 = vadd.f32 1.0, %v359_v19 }
  0x12   :  { %v363_v23 = vpop.eup %362  ;;  %364 = vrcp.f32 %v38_v20  ;;  %v39_v24 = vadd.f32 1.0, %v361_v21 }
  0x13   :  { %366 = vrcp.f32 %v40_v22  ;;  %v41_v25 = vadd.f32 1.0, %v363_v23 }
  0x14   :  { %368 = vrcp.f32 %v39_v24 }
  0x15   :  { %370 = vrcp.f32 %v41_v25 }
  0x1c   :  { %v365_v28 = vpop.eup %364 }
  0x1d   :  { %v367_v30 = vpop.eup %366  ;;  %v50_v31 = vmul.f32 %v365_v28, %v18_v26 }
  0x1e   :  { %v369_v33 = vpop.eup %368  ;;  %v52_v34 = vmul.f32 %v367_v30, %v20_v27 }
  0x1f   :  { %v371_v35 = vpop.eup %370  ;;  %55 = vst.msk [vmem:[%s545_s3] sm:$0xff] %vm54_vm0, %v50_v31  ;;  %326 = vmatprep.mubr.msk.f32.mxu0 %vm54_vm0, %v50_v31  ;;  %v51_v36 = vmul.f32 %v369_v33, %v19_v29  ;;  %v59_v37 = vsel %vm54_vm0, %v50_v31, 0.0 }
  0x20   :  { %57 = vst.msk [vmem:[%s545_s3 + $0x10] sm:$0xff] %vm54_vm0, %v52_v34  ;;  %329 = vmatprep.mubr.msk.f32.mxu1 %vm54_vm0, %v52_v34  ;;  %v53_v38 = vmul.f32 %v371_v35, %v21_v32  ;;  %60 = vadd.xlane.f32.xlu1 %v59_v37  ;;  %v65_v41 = vsel %vm54_vm0, %v52_v34, 0.0 }
  0x21   :  { %56 = vst.msk [vmem:[%s545_s3 + $0x8] sm:$0xff] %vm54_vm0, %v51_v36  ;;  %v62_v39 = vsel %vm54_vm0, %v51_v36, 0.0 }
  0x22   :  { %58 = vst.msk [vmem:[%s545_s3 + $0x18] sm:$0xff] %vm54_vm0, %v53_v38  ;;  %v68_v40 = vsel %vm54_vm0, %v53_v38, 0.0 }
  0x24   :  { %63 = vadd.xlane.f32.xlu1 %v62_v39 }
  0x28   :  { %69 = vadd.xlane.f32.xlu1 %v68_v40 }
  0x29   :  { %66 = vadd.xlane.f32.xlu0 %v65_v41 }
  0x78   :  { %v348_v42 = vpop.permute.xlu0 %347 }
  0x79   :  { %v350_v43 = vunpack.i.h.bf16 %v348_v42  ;;  %v349_v44 = vunpack.i.l.bf16 %v348_v42 }
  0x7b   :  { %v102_v45 = vsel %vm100_vm1, %v412_v1, %v350_v43  ;;  %v101_v46 = vsel %vm100_vm1, %v407_v0, %v349_v44 }
  0x7c   :  { %v332_v47 = vpack.c.bf16 %v102_v45, %v101_v46  ;;  %v353_v48 = vpop.permute.xlu0 %352 }
  0x7d   :  { %v355_v49 = vunpack.i.h.bf16 %v353_v48  ;;  %v354_v50 = vunpack.i.l.bf16 %v353_v48 }
  0x7e   :  { %333 = vmatprep.subr.bf16.mxu0 %v332_v47  ;;  %340 = vmatprep.subr.bf16.mxu1 %v332_v47 }
  0x7f   :  { %v104_v51 = vsel %vm100_vm1, %v426_v5, %v355_v49  ;;  %v103_v52 = vsel %vm100_vm1, %v417_v2, %v354_v50  ;;  %335 = vmatpush3.bf16.msra.mxu0 %v332_v47  ;;  %342 = vmatpush3.bf16.msra.mxu1 %v332_v47 }
  0x80   :  { %v336_v53 = vpack.c.bf16 %v104_v51, %v103_v52 }
  0x82   :  { %337 = vmatprep.subr.bf16.mxu0 %v336_v53  ;;  %341 = vmatprep.subr.bf16.mxu1 %v336_v53 }
  0x83   :  { %339 = vmatpush3.bf16.msra.mxu0 %v336_v53  ;;  %343 = vmatpush3.bf16.msra.mxu1 %v336_v53 }
  0x86   :  { %327 = vmatmul.mubr.msk.f32.vlgmr.msra.gmra.mrb[0].mxu0 %vm54_vm0, %v51_v36  ;;  %330 = vmatmul.mubr.msk.f32.vlgmr.msra.gmra.mrb[0].mxu1 %vm54_vm0, %v53_v38 }
  0xad   :  { %v61_v54 = vpop.xlane.xlu1 %60 }
  0xae   :  { %v202_v55 = vmul.f32 %v407_v0, %v61_v54 }
  0xb0   :  { %v242_v56 = vmul.f32 %v202_v55, %v407_v0 }
  0xb1   :  { %v64_v57 = vpop.xlane.xlu1 %63 }
  0xb2   :  { %v203_v58 = vmul.f32 %v412_v1, %v64_v57  ;;  %250 = vrot.lane.b32.xlu0 %v242_v56, %s372_s8 }
  0xb4   :  { %v243_v59 = vmul.f32 %v203_v58, %v412_v1 }
  0xb5   :  { %v70_v63 = vpop.xlane.xlu1 %69 }
  0xb6   :  { %v67_v60 = vpop.xlane.xlu0 %66  ;;  %252 = vrot.lane.b32.xlu1 %v243_v59, %s372_s8  ;;  %v205_v4 = vmul.f32 %v426_v5, %v70_v63 }
  0xb7   :  { %v204_v61 = vmul.f32 %v417_v2, %v67_v60 }
  0xb8   :  { %v245_v20 = vmul.f32 %v205_v4, %v426_v5 }
  0xb9   :  { %v244_v62 = vmul.f32 %v204_v61, %v417_v2 }
  0xbb   :  { %254 = vrot.lane.b32.xlu1 %v244_v62, %s372_s8 }
 0x124   :  { %v251_v28 = vpop.permute.xlu0 %250 }
 0x128   :  { %v253_v21 = vpop.permute.xlu1 %252 }
 0x12d   :  { %v255_v22 = vpop.permute.xlu1 %254 }
 0x159   :  { %v328_v7 = vpop.f32.mrb[0].mxu0  ;;  %v331_v8 = vpop.f32.mrb[0].mxu1 }
 0x15a   :  { %v207_v9 = vsub.f32 %v328_v7, %v203_v58  ;;  %v219_v10 = vmul.f32 %v328_v7, %v215_v3  ;;  %v183_v11 = vpop.f32.mrb[1].mxu0  ;;  %v193_v12 = vpop.f32.mrb[1].mxu1  ;;  %v209_v13 = vsub.f32 %v331_v8, %v205_v4  ;;  %v221_v1 = vmul.f32 %v331_v8, %v217_v6 }
 0x15b   :  { %v206_v14 = vsub.f32 %v183_v11, %v202_v55  ;;  %v208_v15 = vsub.f32 %v193_v12, %v204_v61  ;;  %v218_v17 = vmul.f32 %v214_v16, %v183_v11  ;;  %v220_v19 = vmul.f32 %v216_v18, %v193_v12 }
 0x15c   :  { %211 = vst.msk [vmem:[%s546_s5 + $0x8] sm:$0xff] %vm100_vm1, %v207_v9  ;;  %213 = vst.msk [vmem:[%s546_s5 + $0x18] sm:$0xff] %vm100_vm1, %v209_v13  ;;  %228 = vrot.lane.b32.xlu1 %v219_v10, %s372_s8 }
 0x15d   :  { %210 = vst.msk [vmem:[%s546_s5] sm:$0xff] %vm100_vm1, %v206_v14  ;;  %212 = vst.msk [vmem:[%s546_s5 + $0x10] sm:$0xff] %vm100_vm1, %v208_v15  ;;  %s373_s5 = smov 125  }
 0x160   :  { %232 = vrot.lane.b32.xlu1 %v221_v1, %s372_s8 }
 0x164   :  { %226 = vrot.lane.b32.xlu1 %v218_v17, %s372_s8 }
 0x168   :  { %230 = vrot.lane.b32.xlu1 %v220_v19, %s372_s8 }
 0x16c   :  { %256 = vrot.lane.b32.xlu1 %v245_v20, %s372_s8 }
 0x1ce   :  { %v229_v23 = vpop.permute.xlu1 %228 }
 0x1cf   :  { %v239_v24 = vsub.f32 %v328_v7, %v229_v23 }
 0x1d1   :  { %v263_v25 = vadd.f32 %v253_v21, %v239_v24 }
 0x1d2   :  { %v233_v0 = vpop.permute.xlu1 %232 }
 0x1d3   :  { %v267_v26 = vmul.f32 0.5, %v263_v25  ;;  %v241_v32 = vsub.f32 %v331_v8, %v233_v0 }
 0x1d5   :  { %276 = vrot.lane.b32.xlu1 %v267_v26, %s373_s5 }
 0x1d6   :  { %v227_v27 = vpop.permute.xlu1 %226 }
 0x1d7   :  { %v238_v2 = vsub.f32 %v183_v11, %v227_v27 }
 0x1d9   :  { %v262_v29 = vadd.f32 %v251_v28, %v238_v2 }
 0x1da   :  { %v231_v30 = vpop.permute.xlu1 %230 }
 0x1db   :  { %v266_v31 = vmul.f32 0.5, %v262_v29  ;;  %v240_v5 = vsub.f32 %v193_v12, %v231_v30 }
 0x1dd   :  { %v264_v33 = vadd.f32 %v255_v22, %v240_v5  ;;  %274 = vrot.lane.b32.xlu1 %v266_v31, %s373_s5 }
 0x1de   :  { %v257_v34 = vpop.permute.xlu1 %256 }
 0x1df   :  { %v268_v35 = vmul.f32 0.5, %v264_v33  ;;  %v265_v36 = vadd.f32 %v257_v34, %v241_v32 }
 0x1e1   :  { %v269_v37 = vmul.f32 0.5, %v265_v36  ;;  %278 = vrot.lane.b32.xlu0 %v268_v35, %s373_s5 }
 0x1e3   :  { %280 = vrot.lane.b32.xlu1 %v269_v37, %s373_s5 }
 0x247   :  { %v277_v38 = vpop.permute.xlu1 %276 }
 0x248   :  { %287 = vst.msk [vmem:[%s547_s4 + $0x8] sm:$0xff] %vm100_vm1, %v277_v38 }
 0x24f   :  { %v275_v39 = vpop.permute.xlu1 %274 }
 0x250   :  { %286 = vst.msk [vmem:[%s547_s4] sm:$0xff] %vm100_vm1, %v275_v39 }
 0x253   :  { %v279_v40 = vpop.permute.xlu0 %278 }
 0x254   :  { %288 = vst.msk [vmem:[%s547_s4 + $0x10] sm:$0xff] %vm100_vm1, %v279_v40 }
 0x255   :  { %v281_v41 = vpop.permute.xlu1 %280 }
 0x256   :  { %289 = vst.msk [vmem:[%s547_s4 + $0x18] sm:$0xff] %vm100_vm1, %v281_v41 }

// kernel: dc_dirgnn_forward.7
= control target key start
LH: loop header
LB: loop body
LE: loop exit
PB: predicated region body
PF: predicated region fallthrough
CT: control target
= control target key end

     0   :  { %s621_s9 = smov 3   ;;  %vm25_vm0 = vcmask 261120   ;;  %vm101_vm1 = vcmask 23552   ;;  %vm106_vm2 = vcmask 48128   ;;  %s627_s24 = smov 122   ;;  %vm535_vm3 = vcmask 7168   ;;  %s901_s3 = inlined_call_operand.vmem [shape: f32[32,3], index: 3, kind: input, shape index: {}]   ;;  %s902_s1 = inlined_call_operand.vmem [shape: f32[32,3], index: 1, kind: input, shape index: {}]   ;;  %s903_s0 = inlined_call_operand.vmem [shape: f32[32,32], index: 0, kind: input, shape index: {}]   ;;  %s904_s2 = inlined_call_operand.vmem [shape: f32[32,3], index: 2, kind: input, shape index: {}]   ;;  %s905_s4 = inlined_call_operand.vmem [shape: f32[1,32], index: 4, kind: input, shape index: {}]   ;;  %s906_s5 = inlined_call_operand.vmem [shape: f32[32,1], index: 5, kind: output, shape index: {}]  }
   0x1   :  { %v661_v0 = vld [vmem:[%s901_s3] sm:$0xff]  ;;  %v666_v1 = vld [vmem:[%s901_s3 + $0x8] sm:$0xff]  ;;  %v685_v6 = vld [vmem:[%s901_s3 + $0x10] sm:$0xff] }
   0x2   :  { %v671_v2 = vld [vmem:[%s902_s1] sm:$0xff]  ;;  %v590_v3 = vpack.i.bf16 %v666_v1, %v661_v0  ;;  %v678_v4 = vld [vmem:[%s902_s1 + $0x8] sm:$0xff]  ;;  %v690_v7 = vld [vmem:[%s901_s3 + $0x18] sm:$0xff] }
   0x3   :  { %v65_v5 = vmul.f32 %v661_v0, %v671_v2  ;;  %v66_v8 = vmul.f32 %v666_v1, %v678_v4  ;;  %v600_v9 = vpack.i.bf16 %v690_v7, %v685_v6  ;;  %v699_v10 = vld [vmem:[%s902_s1 + $0x10] sm:$0xff]  ;;  %v704_v11 = vld [vmem:[%s902_s1 + $0x18] sm:$0xff]  ;;  %v21_v16 = vld [vmem:[%s903_s0] sm:$0xff]  ;;  %s622_s1 = smov 6  }
   0x4   :  { %591 = vrot.lane.b32.xlu0 %v590_v3, %s621_s9  ;;  %v67_v12 = vmul.f32 %v685_v6, %v699_v10  ;;  %v68_v13 = vmul.f32 %v690_v7, %v704_v11  ;;  %565 = vmatprep.mubr.msk.f32.mxu0 %vm25_vm0, %v21_v16  ;;  %v23_v17 = vld [vmem:[%s903_s0 + $0x10] sm:$0xff]  ;;  %v26_v18 = vsel %vm25_vm0, %v21_v16, 0.0  ;;  %v22_v20 = vld [vmem:[%s903_s0 + $0x8] sm:$0xff]  ;;  %v24_v22 = vld [vmem:[%s903_s0 + $0x18] sm:$0xff] }
   0x5   :  { %601 = vrot.lane.b32.xlu1 %v600_v9, %s621_s9  ;;  %v595_v14 = vpack.i.bf16 %v66_v8, %v65_v5  ;;  %568 = vmatprep.mubr.msk.f32.mxu1 %vm25_vm0, %v23_v17  ;;  %v32_v19 = vsel %vm25_vm0, %v23_v17, 0.0  ;;  %v29_v21 = vsel %vm25_vm0, %v22_v20, 0.0  ;;  %v35_v23 = vsel %vm25_vm0, %v24_v22, 0.0  ;;  %v733_v30 = vld [vmem:[%s904_s2 + $0x10] sm:$0xff]  ;;  %v738_v31 = vld [vmem:[%s904_s2 + $0x18] sm:$0xff]  ;;  %v743_v32 = vld [vmem:[%s904_s2] sm:$0xff] }
   0x6   :  { %v605_v15 = vpack.i.bf16 %v68_v13, %v67_v12  ;;  %v748_v33 = vld [vmem:[%s904_s2 + $0x8] sm:$0xff]  ;;  %s623_s2 = smov 125   ;;  %v624_v9 = vmov 1  }
   0x7   :  { %611 = vset.pattern.permute.xlu0 %v624_v9 }
   0x8   :  { %596 = vrot.lane.b32.xlu0 %v595_v14, %s622_s1 }
   0x9   :  { %606 = vrot.lane.b32.xlu1 %v605_v15, %s622_s1 }
  0x27   :  { %27 = vadd.xlane.f32.xlu0 %v26_v18 }
  0x2b   :  { %33 = vadd.xlane.f32.xlu0 %v32_v19 }
  0x2d   :  { %30 = vadd.xlane.f32.xlu1 %v29_v21 }
  0x2f   :  { %36 = vadd.xlane.f32.xlu0 %v35_v23 }
  0x76   :  { %v592_v24 = vpop.permute.xlu0 %591 }
  0x77   :  { %v602_v25 = vpop.permute.xlu1 %601  ;;  %v594_v26 = vunpack.i.h.bf16 %v592_v24  ;;  %v593_v27 = vunpack.i.l.bf16 %v592_v24 }
  0x78   :  { %v604_v28 = vunpack.i.h.bf16 %v602_v25  ;;  %v603_v29 = vunpack.i.l.bf16 %v602_v25 }
  0x79   :  { %v102_v40 = vsel %vm101_vm1, %v743_v32, %v593_v27  ;;  %v103_v41 = vsel %vm101_vm1, %v748_v33, %v594_v26 }
  0x7a   :  { %v597_v34 = vpop.permute.xlu0 %596  ;;  %v104_v35 = vsel %vm101_vm1, %v733_v30, %v603_v29  ;;  %v105_v36 = vsel %vm101_vm1, %v738_v31, %v604_v28 }
  0x7b   :  { %v599_v37 = vunpack.i.h.bf16 %v597_v34  ;;  %v598_v38 = vunpack.i.l.bf16 %v597_v34  ;;  %v607_v39 = vpop.permute.xlu1 %606 }
  0x7c   :  { %v609_v42 = vunpack.i.h.bf16 %v607_v39  ;;  %v608_v43 = vunpack.i.l.bf16 %v607_v39 }
  0x7d   :  { %v108_v44 = vsel %vm106_vm2, %v103_v41, %v599_v37  ;;  %v107_v45 = vsel %vm106_vm2, %v102_v40, %v598_v38 }
  0x7e   :  { %v571_v46 = vpack.c.bf16 %v108_v44, %v107_v45  ;;  %v110_v47 = vsel %vm106_vm2, %v105_v36, %v609_v42  ;;  %v109_v48 = vsel %vm106_vm2, %v104_v35, %v608_v43 }
  0x7f   :  { %v575_v49 = vpack.c.bf16 %v110_v47, %v109_v48 }
  0x80   :  { %572 = vmatprep.subr.bf16.mxu0 %v571_v46  ;;  %579 = vmatprep.subr.bf16.mxu1 %v571_v46 }
  0x81   :  { %574 = vmatpush3.bf16.msra.mxu0 %v571_v46  ;;  %581 = vmatpush3.bf16.msra.mxu1 %v571_v46 }
  0x82   :  { %576 = vmatprep.subr.bf16.mxu0 %v575_v49  ;;  %580 = vmatprep.subr.bf16.mxu1 %v575_v49 }
  0x85   :  { %578 = vmatpush3.bf16.msra.mxu0 %v575_v49  ;;  %582 = vmatpush3.bf16.msra.mxu1 %v575_v49 }
  0x88   :  { %566 = vmatmul.mubr.msk.f32.vlgmr.msra.gmra.mrb[0].mxu0 %vm25_vm0, %v22_v20  ;;  %569 = vmatmul.mubr.msk.f32.vlgmr.msra.gmra.mrb[0].mxu1 %vm25_vm0, %v24_v22 }
  0xb4   :  { %v28_v50 = vpop.xlane.xlu0 %27 }
  0xb5   :  { %v208_v51 = vmul.f32 %v671_v2, %v28_v50  ;;  %v760_v55 = vmul.f32 %v743_v32, %v28_v50 }
  0xb7   :  { %v212_v53 = vadd.f32 %v208_v51, %v661_v0  ;;  %v288_v16 = vmul.f32 %v208_v51, %v661_v0 }
  0xb8   :  { %v34_v52 = vpop.xlane.xlu0 %33 }
  0xb9   :  { %v210_v54 = vmul.f32 %v699_v10, %v34_v52  ;;  %v763_v56 = vmul.f32 %v733_v30, %v34_v52  ;;  %v264_v63 = vmul.f32 %v212_v53, %v661_v0 }
  0xba   :  { %v765_v57 = vpop.xlane.xlu1 %30 }
  0xbb   :  { %v214_v60 = vadd.f32 %v210_v54, %v685_v6  ;;  %v209_v3 = vmul.f32 %v678_v4, %v765_v57  ;;  %v290_v26 = vmul.f32 %v210_v54, %v685_v6 }
  0xbc   :  { %v786_v12 = vpop.xlane.xlu0 %36 }
  0xbd   :  { %v266_v13 = vmul.f32 %v214_v60, %v685_v6  ;;  %v213_v14 = vadd.f32 %v209_v3, %v666_v1  ;;  %v211_v15 = vmul.f32 %v704_v11, %v786_v12  ;;  %v289_v20 = vmul.f32 %v209_v3, %v666_v1 }
  0xbe   :  { %v626_v6 = vmov 2  }
  0xbf   :  { %v215_v17 = vadd.f32 %v211_v15, %v690_v7  ;;  %v265_v18 = vmul.f32 %v213_v14, %v666_v1 }
  0xc1   :  { %v267_v19 = vmul.f32 %v215_v17, %v690_v7  ;;  %v217_v17 = vmul.f32 %v748_v33, %v765_v57 }
 0x15b   :  { %v767_v58 = vpop.f32.mrb[0].mxu0  ;;  %v769_v59 = vpop.f32.mrb[0].mxu1 }
 0x15c   :  { %v772_v61 = vpop.f32.mrb[1].mxu0  ;;  %230 = vrot.lane.b32.xlu0 %v767_v58, %s623_s2  ;;  %v775_v62 = vpop.f32.mrb[1].mxu1 }
 0x15d   :  { %v220_v5 = vsub.f32 %v772_v61, %v760_v55  ;;  %228 = vrot.lane.b32.xlu1 %v772_v61, %s623_s2  ;;  %v222_v8 = vsub.f32 %v775_v62, %v763_v56 }
 0x160   :  { %272 = vrot.lane.b32.xlu0 %v264_v63, %s622_s1 }
 0x161   :  { %232 = vrot.lane.b32.xlu1 %v775_v62, %s623_s2 }
 0x164   :  { %276 = vrot.lane.b32.xlu0 %v266_v13, %s622_s1 }
 0x165   :  { %234 = vrot.lane.b32.xlu1 %v769_v59, %s623_s2 }
 0x168   :  { %296 = vrot.lane.b32.xlu0 %v288_v16, %s622_s1 }
 0x169   :  { %274 = vrot.lane.b32.xlu1 %v265_v18, %s622_s1  ;;  %v221_v18 = vsub.f32 %v767_v58, %v217_v17 }
 0x16d   :  { %278 = vrot.lane.b32.xlu1 %v267_v19, %s622_s1  ;;  %v317_v19 = vmul.f32 0.5, %v221_v18 }
 0x171   :  { %298 = vrot.lane.b32.xlu1 %v289_v20, %s622_s1  ;;  %v219_v20 = vmul.f32 %v738_v31, %v786_v12 }
 0x173   :  { %v223_v57 = vsub.f32 %v769_v59, %v219_v20 }
 0x175   :  { %v319_v55 = vmul.f32 0.5, %v223_v57 }
 0x1ce   :  { %v231_v0 = vpop.permute.xlu0 %230 }
 0x1cf   :  { %v241_v21 = vmul.f32 %v231_v0, %v678_v4  ;;  %v229_v22 = vpop.permute.xlu1 %228  ;;  %v625_v4 = vmov 0  }
 0x1d0   :  { %v240_v23 = vmul.f32 %v229_v22, %v671_v2  ;;  %v291_v2 = vmul.f32 %v211_v15, %v690_v7  ;;  %610 = vset.pattern.permute.xlu1 %v625_v4 }
 0x1d1   :  { %250 = vrot.lane.b32.xlu1 %v241_v21, %s622_s1 }
 0x1d2   :  { %248 = vrot.lane.b32.xlu0 %v240_v23, %s622_s1 }
 0x1d3   :  { %v233_v24 = vpop.permute.xlu1 %232 }
 0x1d4   :  { %v242_v25 = vmul.f32 %v233_v24, %v699_v10  ;;  %v273_v10 = vpop.permute.xlu0 %272 }
 0x1d6   :  { %252 = vrot.lane.b32.xlu0 %v242_v25, %s622_s1  ;;  %v548_v25 = vld [vmem:[%s905_s4] ss:$0 sm:$0xff] }
 0x1d7   :  { %v235_v1 = vpop.permute.xlu1 %234 }
 0x1d8   :  { %v243_v27 = vmul.f32 %v235_v1, %v704_v11  ;;  %v277_v28 = vpop.permute.xlu0 %276 }
 0x1da   :  { %300 = vrot.lane.b32.xlu0 %v290_v26, %s622_s1  ;;  %254 = vrot.lane.b32.xlu1 %v243_v27, %s622_s1 }
 0x1db   :  { %v275_v7 = vpop.permute.xlu1 %274 }
 0x1dc   :  { %v297_v34 = vpop.permute.xlu0 %296 }
 0x1de   :  { %302 = vrot.lane.b32.xlu1 %v291_v2, %s622_s1  ;;  %416 = vperm.xlu0 %611, %v743_v32  }
 0x1df   :  { %v279_v11 = vpop.permute.xlu1 %278 }
 0x1e2   :  { %420 = vperm.xlu0 %611, %v748_v33  }
 0x1e3   :  { %v299_v29 = vpop.permute.xlu1 %298 }
 0x1e6   :  { %424 = vperm.xlu0 %611, %v733_v30  }
 0x1ea   :  { %428 = vperm.xlu0 %611, %v738_v31  }
 0x1ee   :  { %613 = vset.pattern.permute.xlu0 %v626_v6 }
 0x1ef   :  { %480 = vperm.xlu0 %613, %v748_v33  }
 0x1f3   :  { %484 = vperm.xlu0 %613, %v733_v30  }
 0x243   :  { %v251_v35 = vpop.permute.xlu1 %250 }
 0x244   :  { %v261_v36 = vsub.f32 %v767_v58, %v251_v35  ;;  %v249_v37 = vpop.permute.xlu0 %248 }
 0x245   :  { %v260_v38 = vsub.f32 %v772_v61, %v249_v37 }
 0x246   :  { %v285_v39 = vsub.f32 %v261_v36, %v275_v7 }
 0x247   :  { %v284_v40 = vsub.f32 %v260_v38, %v273_v10 }
 0x248   :  { %v253_v41 = vpop.permute.xlu0 %252  ;;  %v309_v42 = vadd.f32 %v299_v29, %v285_v39 }
 0x249   :  { %v262_v43 = vsub.f32 %v775_v62, %v253_v41  ;;  %v308_v44 = vadd.f32 %v297_v34, %v284_v40 }
 0x24a   :  { %v313_v45 = vmul.f32 0.5, %v309_v42 }
 0x24b   :  { %v286_v46 = vsub.f32 %v262_v43, %v277_v28  ;;  %v312_v47 = vmul.f32 0.5, %v308_v44 }
 0x24c   :  { %326 = vrot.lane.b32.xlu1 %v313_v45, %s627_s24  ;;  %v255_v48 = vpop.permute.xlu1 %254  ;;  %v301_v49 = vpop.permute.xlu0 %300 }
 0x24d   :  { %v263_v50 = vsub.f32 %v769_v59, %v255_v48  ;;  %v310_v51 = vadd.f32 %v301_v49, %v286_v46  ;;  %324 = vrot.lane.b32.xlu0 %v312_v47, %s627_s24 }
 0x24f   :  { %v314_v52 = vmul.f32 0.5, %v310_v51  ;;  %v287_v53 = vsub.f32 %v263_v50, %v279_v11 }
 0x250   :  { %v303_v54 = vpop.permute.xlu1 %302 }
 0x251   :  { %v311_v60 = vadd.f32 %v303_v54, %v287_v53  ;;  %328 = vrot.lane.b32.xlu0 %v314_v52, %s627_s24 }
 0x253   :  { %v315_v63 = vmul.f32 0.5, %v311_v60 }
 0x255   :  { %330 = vrot.lane.b32.xlu1 %v315_v63, %s627_s24  ;;  %488 = vperm.xlu0 %613, %v738_v31  }
 0x259   :  { %348 = vperm.xlu1 %610, %v748_v33   ;;  %614 = vset.pattern.permute.xlu0 %v625_v4  ;;  %v318_v33 = vmul.f32 0.5, %v222_v8 }
 0x25a   :  { %343 = vperm.xlu0 %614, %v743_v32  }
 0x25d   :  { %353 = vperm.xlu1 %610, %v733_v30   ;;  %v835_v3 = vpop.permute.xlu0 %416 }
 0x25e   :  { %358 = vperm.xlu0 %614, %v738_v31   ;;  %v431_v54 = vmul.f32 %v548_v25, %v835_v3 }
 0x261   :  { %612 = vset.pattern.permute.xlu1 %v626_v6  ;;  %v421_v13 = vpop.permute.xlu0 %420 }
 0x262   :  { %476 = vperm.xlu1 %612, %v743_v32   ;;  %v316_v32 = vmul.f32 0.5, %v220_v5  ;;  %v432_v36 = vmul.f32 %v548_v25, %v421_v13 }
 0x265   :  { %v837_v14 = vpop.permute.xlu0 %424 }
 0x266   :  { %617 = vset.pattern.permute.xlu1 %v625_v4 }
 0x269   :  { %v839_v15 = vpop.permute.xlu0 %428 }
 0x26a   :  { %v434_v40 = vmul.f32 %v548_v25, %v839_v15 }
 0x26e   :  { %v841_v16 = vpop.permute.xlu0 %480 }
 0x26f   :  { %v492_v48 = vmul.f32 %v548_v25, %v841_v16 }
 0x272   :  { %v845_v30 = vpop.permute.xlu0 %484 }
 0x2be   :  { %v327_v0 = vpop.permute.xlu1 %326 }
 0x2bf   :  { %v337_v21 = vsub.f32 %v317_v19, %v327_v0  ;;  %v325_v22 = vpop.permute.xlu0 %324  ;;  %v433_v19 = vmul.f32 %v548_v25, %v837_v14 }
 0x2c0   :  { %v336_v23 = vsub.f32 %v316_v32, %v325_v22 }
 0x2c1   :  { %378 = vperm.xlu0 %614, %v337_v21  }
 0x2c2   :  { %373 = vperm.xlu1 %617, %v336_v23  }
 0x2c3   :  { %v329_v58 = vpop.permute.xlu0 %328 }
 0x2c4   :  { %v338_v24 = vsub.f32 %v318_v33, %v329_v58 }
 0x2c6   :  { %383 = vperm.xlu1 %617, %v338_v24  }
 0x2c7   :  { %v331_v61 = vpop.permute.xlu1 %330 }
 0x2c8   :  { %v339_v5 = vsub.f32 %v319_v55, %v331_v61 }
 0x2ca   :  { %388 = vperm.xlu0 %614, %v339_v5   ;;  %619 = vset.pattern.permute.xlu1 %v626_v6 }
 0x2cb   :  { %496 = vperm.xlu1 %619, %v336_v23  }
 0x2ce   :  { %615 = vset.pattern.permute.xlu0 %v624_v9 }
 0x2cf   :  { %440 = vperm.xlu0 %615, %v337_v21   ;;  %504 = vperm.xlu1 %619, %v338_v24  }
 0x2d3   :  { %448 = vperm.xlu0 %615, %v339_v5  }
 0x2d4   :  { %v862_v56 = vpop.permute.xlu0 %488 }
 0x2d5   :  { %v494_v57 = vmul.f32 %v548_v25, %v862_v56 }
 0x2d7   :  { %616 = vset.pattern.permute.xlu0 %v626_v6 }
 0x2d8   :  { %500 = vperm.xlu0 %616, %v337_v21   ;;  %v349_v31 = vpop.permute.xlu1 %348 }
 0x2d9   :  { %v344_v59 = vpop.permute.xlu0 %343  ;;  %v368_v1 = vmul.f32 %v548_v25, %v349_v31 }
 0x2da   :  { %v367_v26 = vmul.f32 %v548_v25, %v344_v59 }
 0x2dc   :  { %618 = vset.pattern.permute.xlu0 %v624_v9  ;;  %v354_v62 = vpop.permute.xlu1 %353 }
 0x2dd   :  { %436 = vperm.xlu0 %618, %v336_v23   ;;  %v359_v8 = vpop.permute.xlu0 %358  ;;  %v369_v45 = vmul.f32 %v548_v25, %v354_v62  ;;  %v493_v23 = vmul.f32 %v548_v25, %v845_v30 }
 0x2de   :  { %v370_v11 = vmul.f32 %v548_v25, %v359_v8 }
 0x2e1   :  { %444 = vperm.xlu0 %618, %v338_v24   ;;  %v477_v12 = vpop.permute.xlu1 %476 }
 0x2e2   :  { %v491_v17 = vmul.f32 %v548_v25, %v477_v12 }
 0x2e5   :  { %620 = vset.pattern.permute.xlu0 %v626_v6 }
 0x2e6   :  { %508 = vperm.xlu0 %620, %v339_v5  }
 0x340   :  { %v379_v27 = vpop.permute.xlu0 %378 }
 0x341   :  { %v392_v9 = vsub.f32 %v368_v1, %v379_v27  ;;  %v374_v2 = vpop.permute.xlu1 %373 }
 0x342   :  { %v391_v4 = vsub.f32 %v367_v26, %v374_v2 }
 0x343   :  { %v396_v7 = vmax.f32 %v392_v9, 0.0 }
 0x344   :  { %v395_v6 = vmax.f32 %v391_v4, 0.0 }
 0x345   :  { %v402_v10 = vsel %vm25_vm0, %v396_v7, 0.0  ;;  %v384_v46 = vpop.permute.xlu1 %383 }
 0x346   :  { %403 = vadd.xlane.f32.xlu1 %v402_v10  ;;  %v399_v29 = vsel %vm25_vm0, %v395_v6, 0.0  ;;  %v393_v51 = vsub.f32 %v369_v45, %v384_v46 }
 0x348   :  { %v397_v60 = vmax.f32 %v393_v51, 0.0 }
 0x349   :  { %v389_v28 = vpop.permute.xlu0 %388 }
 0x34a   :  { %v394_v34 = vsub.f32 %v370_v11, %v389_v28  ;;  %400 = vadd.xlane.f32.xlu1 %v399_v29  ;;  %v497_v63 = vpop.permute.xlu1 %496  ;;  %v405_v20 = vsel %vm25_vm0, %v397_v60, 0.0 }
 0x34b   :  { %v511_v0 = vsub.f32 %v491_v17, %v497_v63 }
 0x34c   :  { %v398_v35 = vmax.f32 %v394_v34, 0.0 }
 0x34d   :  { %v515_v58 = vmax.f32 %v511_v0, 0.0 }
 0x34e   :  { %v441_v37 = vpop.permute.xlu0 %440  ;;  %v408_v38 = vsel %vm25_vm0, %v398_v35, 0.0  ;;  %v505_v3 = vpop.permute.xlu1 %504 }
 0x34f   :  { %v452_v39 = vsub.f32 %v432_v36, %v441_v37  ;;  %409 = vadd.xlane.f32.xlu0 %v408_v38  ;;  %v513_v24 = vsub.f32 %v493_v23, %v505_v3  ;;  %v519_v59 = vsel %vm25_vm0, %v515_v58, 0.0 }
 0x351   :  { %v456_v41 = vmax.f32 %v452_v39, 0.0  ;;  %v517_v31 = vmax.f32 %v513_v24, 0.0 }
 0x352   :  { %v449_v42 = vpop.permute.xlu0 %448 }
 0x353   :  { %v454_v43 = vsub.f32 %v434_v40, %v449_v42  ;;  %v462_v44 = vsel %vm25_vm0, %v456_v41, 0.0  ;;  %v525_v30 = vsel %vm25_vm0, %v517_v31, 0.0 }
 0x354   :  { %463 = vadd.xlane.f32.xlu0 %v462_v44 }
 0x355   :  { %v458_v47 = vmax.f32 %v454_v43, 0.0 }
 0x357   :  { %v501_v49 = vpop.permute.xlu0 %500  ;;  %v468_v50 = vsel %vm25_vm0, %v458_v47, 0.0 }
 0x358   :  { %v512_v52 = vsub.f32 %v492_v48, %v501_v49  ;;  %469 = vadd.xlane.f32.xlu0 %v468_v50 }
 0x35a   :  { %v516_v53 = vmax.f32 %v512_v52, 0.0 }
 0x35c   :  { %v437_v13 = vpop.permute.xlu0 %436  ;;  %v522_v15 = vsel %vm25_vm0, %v516_v53, 0.0 }
 0x35d   :  { %v451_v18 = vsub.f32 %v431_v54, %v437_v13  ;;  %523 = vadd.xlane.f32.xlu0 %v522_v15 }
 0x35f   :  { %v455_v16 = vmax.f32 %v451_v18, 0.0 }
 0x360   :  { %v445_v32 = vpop.permute.xlu0 %444 }
 0x361   :  { %v453_v21 = vsub.f32 %v433_v19, %v445_v32  ;;  %406 = vadd.xlane.f32.xlu0 %v405_v20  ;;  %v459_v22 = vsel %vm25_vm0, %v455_v16, 0.0 }
 0x362   :  { %460 = vadd.xlane.f32.xlu1 %v459_v22 }
 0x363   :  { %v457_v33 = vmax.f32 %v453_v21, 0.0 }
 0x365   :  { %v509_v55 = vpop.permute.xlu0 %508  ;;  %v465_v14 = vsel %vm25_vm0, %v457_v33, 0.0 }
 0x366   :  { %v514_v61 = vsub.f32 %v494_v57, %v509_v55  ;;  %466 = vadd.xlane.f32.xlu1 %v465_v14 }
 0x368   :  { %v518_v5 = vmax.f32 %v514_v61, 0.0 }
 0x36a   :  { %520 = vadd.xlane.f32.xlu1 %v519_v59  ;;  %v528_v62 = vsel %vm25_vm0, %v518_v5, 0.0 }
 0x36b   :  { %529 = vadd.xlane.f32.xlu0 %v528_v62 }
 0x36e   :  { %526 = vadd.xlane.f32.xlu1 %v525_v30 }
 0x3d3   :  { %v404_v12 = vpop.xlane.xlu1 %403 }
 0x3d7   :  { %v401_v27 = vpop.xlane.xlu1 %400 }
 0x3dc   :  { %v410_v8 = vpop.xlane.xlu0 %409 }
 0x3e1   :  { %v464_v56 = vpop.xlane.xlu0 %463 }
 0x3e2   :  { %v472_v1 = vadd.f32 %v464_v56, %v404_v12 }
 0x3e5   :  { %v470_v25 = vpop.xlane.xlu0 %469 }
 0x3e6   :  { %v474_v10 = vadd.f32 %v470_v25, %v410_v8 }
 0x3ea   :  { %v524_v26 = vpop.xlane.xlu0 %523 }
 0x3eb   :  { %v532_v9 = vadd.f32 %v524_v26, %v472_v1 }
 0x3ed   :  { %537 = vst.msk [vmem:[%s906_s5 + $0x8] sm:$0xff] %vm535_vm3, %v532_v9 }
 0x3ee   :  { %v407_v7 = vpop.xlane.xlu0 %406 }
 0x3ef   :  { %v461_v2 = vpop.xlane.xlu1 %460 }
 0x3f0   :  { %v471_v6 = vadd.f32 %v461_v2, %v401_v27 }
 0x3f3   :  { %v467_v4 = vpop.xlane.xlu1 %466 }
 0x3f4   :  { %v473_v35 = vadd.f32 %v467_v4, %v407_v7 }
 0x3f7   :  { %v521_v11 = vpop.xlane.xlu1 %520 }
 0x3f8   :  { %v531_v28 = vadd.f32 %v521_v11, %v471_v6  ;;  %v530_v29 = vpop.xlane.xlu0 %529 }
 0x3f9   :  { %v534_v34 = vadd.f32 %v530_v29, %v474_v10 }
 0x3fa   :  { %536 = vst.msk [vmem:[%s906_s5] sm:$0xff] %vm535_vm3, %v531_v28 }
 0x3fb   :  { %539 = vst.msk [vmem:[%s906_s5 + $0x18] sm:$0xff] %vm535_vm3, %v534_v34  ;;  %v527_v36 = vpop.xlane.xlu1 %526 }
 0x3fc   :  { %v533_v37 = vadd.f32 %v527_v36, %v473_v35 }
 0x3fe   :  { %538 = vst.msk [vmem:[%s906_s5 + $0x10] sm:$0xff] %vm535_vm3, %v533_v37 }

</bundles_post_ra>
